<compile_context>
chip_gen: v5e
topology: v5e:2x2
jax: 0.10.0
libtpu: 0.0.40
codegen_flags: <defaults>
</compile_context>

<pallas_src>
import jax
import jax.numpy as jnp
from jax.experimental import pallas as pl
from jax.experimental.pallas import tpu as pltpu

C_IN = 3
C_OUT = 32
H = W = 128
NUM_CLASSES = 10
BN_EPS = 1e-5

HP = H // 2                  # pooled height 64
WP = W // 2                  # pooled width 64
NPOS = HP * WP               # 4096 pooled positions per image
K_TAPS = 32                  # 27 conv taps + 1 bias/shift tap + 4 zero pad
RB = 2048                    # pooled positions per conv grid step
K_FC = C_OUT * NPOS          # 131072
FC_SPLIT = 2                 # parallel halves of the FC contraction
TK = K_FC // FC_SPLIT        # 65536


def conv_bn_relu_pool_kernel(x_ref, w_ref, o_ref):
    """Fused conv3x3(pad=1) + BN(folded) + ReLU + 2x2 max-pool, MXU version.

    x_ref: (4, K_TAPS, RB) bf16 VMEM — for each 2x2-pool quadrant q=(qy,qx),
           an im2col slab [tap, pooled position]; tap 27 is the constant-1
           bias tap, taps 28..31 are zero.
    w_ref: (C_OUT, K_TAPS) bf16 VMEM — BN-scale-folded conv weights; column
           27 holds (conv_b - bn_mean)*scale + bn_beta, columns 28..31 zero.
    o_ref: (C_OUT, RB) f32 VMEM — pooled output, channel-major (row-major
           flatten matches torch.flatten's (C, H, W) order).
    """
    w = w_ref[...]
    m = jnp.dot(w, x_ref[0], preferred_element_type=jnp.float32)
    for q in range(1, 4):
        y = jnp.dot(w, x_ref[q], preferred_element_type=jnp.float32)
        m = jnp.maximum(m, y)           # 2x2 max-pool over the 4 quadrants
    o_ref[...] = jnp.maximum(m, 0.0)    # ReLU (monotone => commutes with max)


def fc_kernel(x_ref, w_ref, o_ref):
    """fc1 on the MXU: (B, TK) bf16 x (10, TK) bf16 -> (B, 10) f32."""
    o_ref[...] = jax.lax.dot_general(
        x_ref[...], w_ref[...],
        dimension_numbers=(((1,), (1,)), ((), ())),
        preferred_element_type=jnp.float32)


def scene_cnn_forward(x, params):
    B = x.shape[0]

    # ---- glue: fold conv bias + BN (running stats) into one MXU weight ----
    scale = params["bn_gamma"] / jnp.sqrt(params["bn_var"] + BN_EPS)
    shift = (params["conv_b"] - params["bn_mean"]) * scale + params["bn_beta"]
    w_f = (params["conv_w"] * scale[:, None, None, None]).reshape(C_OUT, 27)
    w_mat = jnp.concatenate(
        [w_f, shift[:, None], jnp.zeros((C_OUT, K_TAPS - 28), w_f.dtype)],
        axis=1).astype(jnp.bfloat16)                       # (32, 32)

    # ---- glue: per-quadrant im2col (pure data plumbing, bf16) ----
    # x_col[b, qy*2+qx, ci*9+dy*3+dx, hp*64+wp] = x_pad[b, ci, 2hp+qy+dy, 2wp+qx+dx]
    xp = jnp.pad(x.astype(jnp.bfloat16),
                 ((0, 0), (0, 0), (1, 1), (1, 1)))         # (B, 3, 130, 130)
    ones = jnp.ones((B, HP, WP), jnp.bfloat16)
    quads = []
    for qy in range(2):
        for qx in range(2):
            taps = [xp[:, ci, qy + dy: qy + dy + H: 2, qx + dx: qx + dx + W: 2]
                    for ci in range(C_IN) for dy in range(3) for dx in range(3)]
            taps.append(ones)                              # constant bias tap
            q = jnp.stack(taps, axis=1)                    # (B, 28, 64, 64)
            q = jnp.pad(q, ((0, 0), (0, K_TAPS - 28), (0, 0), (0, 0)))
            quads.append(q.reshape(B, K_TAPS, NPOS))
    x_col = jnp.stack(quads, axis=1)                       # (B, 4, 32, 4096)

    pooled = pl.pallas_call(
        conv_bn_relu_pool_kernel,
        out_shape=jax.ShapeDtypeStruct((B, C_OUT, NPOS), jnp.float32),
        grid=(B, NPOS // RB),
        in_specs=[
            pl.BlockSpec((None, 4, K_TAPS, RB), lambda b, r: (b, 0, 0, r)),
            pl.BlockSpec((C_OUT, K_TAPS), lambda b, r: (0, 0)),
        ],
        out_specs=pl.BlockSpec((None, C_OUT, RB), lambda b, r: (b, 0, r)),
        compiler_params=pltpu.CompilerParams(
            dimension_semantics=("parallel", "parallel")),
    )(x_col, w_mat)

    # ---- fc1: flatten (channel-major == torch.flatten order) and matmul ----
    x_flat = pooled.reshape(B, K_FC).astype(jnp.bfloat16)
    fc_w = params["fc_w"].astype(jnp.bfloat16)

    partial = pl.pallas_call(
        fc_kernel,
        out_shape=jax.ShapeDtypeStruct((FC_SPLIT, B, NUM_CLASSES), jnp.float32),
        grid=(FC_SPLIT,),
        in_specs=[
            pl.BlockSpec((B, TK), lambda p: (0, p)),
            pl.BlockSpec((NUM_CLASSES, TK), lambda p: (0, p)),
        ],
        out_specs=pl.BlockSpec((None, B, NUM_CLASSES), lambda p: (p, 0, 0)),
        compiler_params=pltpu.CompilerParams(
            dimension_semantics=("parallel",)),
    )(x_flat, fc_w)

    return partial[0] + partial[1] + params["fc_b"][None, :]


def reference_forward(x, params):
    """Pure-JAX reference mirroring the PyTorch forward (eval-mode BN)."""
    scale = params["bn_gamma"] / jnp.sqrt(params["bn_var"] + BN_EPS)
    y = jax.lax.conv_general_dilated(
        x, params["conv_w"], window_strides=(1, 1), padding=((1, 1), (1, 1)),
        dimension_numbers=("NCHW", "OIHW", "NCHW"),
        precision=jax.lax.Precision.HIGHEST)
    y = y + params["conv_b"][None, :, None, None]
    y = (y - params["bn_mean"][None, :, None, None]) \
        * scale[None, :, None, None] + params["bn_beta"][None, :, None, None]
    y = jnp.maximum(y, 0.0)
    y = jax.lax.reduce_window(y, -jnp.inf, jax.lax.max,
                              (1, 1, 2, 2), (1, 1, 2, 2), "VALID")
    y = y.reshape(y.shape[0], -1)
    return jnp.dot(y, params["fc_w"].T,
                   precision=jax.lax.Precision.HIGHEST) + params["fc_b"]


if __name__ == "__main__":
    key = jax.random.PRNGKey(0)
    kx, kw, kb, kg, kbe, km, kv, kfw, kfb = jax.random.split(key, 9)
    B = 2
    x = jax.random.normal(kx, (B, C_IN, H, W), jnp.float32)
    params = {
        "conv_w": 0.2 * jax.random.normal(kw, (C_OUT, C_IN, 3, 3), jnp.float32),
        "conv_b": 0.1 * jax.random.normal(kb, (C_OUT,), jnp.float32),
        "bn_gamma": 1.0 + 0.1 * jax.random.normal(kg, (C_OUT,), jnp.float32),
        "bn_beta": 0.1 * jax.random.normal(kbe, (C_OUT,), jnp.float32),
        "bn_mean": 0.1 * jax.random.normal(km, (C_OUT,), jnp.float32),
        "bn_var": 0.5 + jnp.abs(jax.random.normal(kv, (C_OUT,), jnp.float32)),
        "fc_w": 0.01 * jax.random.normal(
            kfw, (NUM_CLASSES, C_OUT * HP * WP), jnp.float32),
        "fc_b": 0.1 * jax.random.normal(kfb, (NUM_CLASSES,), jnp.float32),
    }

    out = scene_cnn_forward(x, params)
    out = jax.block_until_ready(out)
    assert out.shape == (B, NUM_CLASSES) and out.dtype == jnp.float32

    ref = reference_forward(x, params)
    assert jnp.allclose(out, ref, rtol=5e-2, atol=5e-2), \
        float(jnp.max(jnp.abs(out - ref)))
    print("KERNEL_OK")
</pallas_src>

<mosaic_0001>
module attributes {stable_mosaic.version = 11 : i64} {
  func.func @conv_bn_relu_pool_kernel(%arg0: i32, %arg1: i32, %arg2: memref<1x4x32x2048xbf16, #tpu.memory_space<vmem>>, %arg3: memref<32x32xbf16, #tpu.memory_space<vmem>>, %arg4: memref<1x32x2048xf32, #tpu.memory_space<vmem>>) attributes {dimension_semantics = [#tpu.dimension_semantics<parallel>, #tpu.dimension_semantics<parallel>], iteration_bounds = array<i64: 2, 2>, scalar_prefetch = 0 : i64, scratch_operands = 0 : i64, tpu.core_type = #tpu.core_type<tc>, window_params = [{transform_indices = @transform_0, window_bounds = array<i64: 1, 4, 32, 2048>}, {pipeline_mode = #tpu.pipeline_mode<synchronous>, transform_indices = @transform_1, window_bounds = array<i64: 32, 32>}, {transform_indices = @transform_2, window_bounds = array<i64: 1, 32, 2048>}]} {
    %c0 = arith.constant 0 : index
    %c0_0 = arith.constant 0 : index
    %0 = vector.load %arg3[%c0, %c0_0] : memref<32x32xbf16, #tpu.memory_space<vmem>>, vector<32x32xbf16>
    %c0_1 = arith.constant 0 : index
    %c0_2 = arith.constant 0 : index
    %c0_3 = arith.constant 0 : index
    %c0_4 = arith.constant 0 : index
    %1 = vector.load %arg2[%c0_1, %c0_2, %c0_3, %c0_4] : memref<1x4x32x2048xbf16, #tpu.memory_space<vmem>>, vector<1x1x32x2048xbf16>
    %2 = vector.shape_cast %1 : vector<1x1x32x2048xbf16> to vector<32x2048xbf16>
    %cst = arith.constant dense<0.000000e+00> : vector<32x2048xf32>
    %3 = tpu.matmul %0, %2, %cst {dimension_numbers = #tpu.dot_dimension_numbers<[1], [0], [0], [1], [0, 0, 1, 1], [], []>} : vector<32x32xbf16>, vector<32x2048xbf16>, vector<32x2048xf32> -> vector<32x2048xf32>
    %c0_5 = arith.constant 0 : index
    %c1 = arith.constant 1 : index
    %c0_6 = arith.constant 0 : index
    %c0_7 = arith.constant 0 : index
    %4 = vector.load %arg2[%c0_5, %c1, %c0_6, %c0_7] : memref<1x4x32x2048xbf16, #tpu.memory_space<vmem>>, vector<1x1x32x2048xbf16>
    %5 = vector.shape_cast %4 : vector<1x1x32x2048xbf16> to vector<32x2048xbf16>
    %cst_8 = arith.constant dense<0.000000e+00> : vector<32x2048xf32>
    %6 = tpu.matmul %0, %5, %cst_8 {dimension_numbers = #tpu.dot_dimension_numbers<[1], [0], [0], [1], [0, 0, 1, 1], [], []>} : vector<32x32xbf16>, vector<32x2048xbf16>, vector<32x2048xf32> -> vector<32x2048xf32>
    %7 = arith.maximumf %3, %6 : vector<32x2048xf32>
    %c0_9 = arith.constant 0 : index
    %c2 = arith.constant 2 : index
    %c0_10 = arith.constant 0 : index
    %c0_11 = arith.constant 0 : index
    %8 = vector.load %arg2[%c0_9, %c2, %c0_10, %c0_11] : memref<1x4x32x2048xbf16, #tpu.memory_space<vmem>>, vector<1x1x32x2048xbf16>
    %9 = vector.shape_cast %8 : vector<1x1x32x2048xbf16> to vector<32x2048xbf16>
    %cst_12 = arith.constant dense<0.000000e+00> : vector<32x2048xf32>
    %10 = tpu.matmul %0, %9, %cst_12 {dimension_numbers = #tpu.dot_dimension_numbers<[1], [0], [0], [1], [0, 0, 1, 1], [], []>} : vector<32x32xbf16>, vector<32x2048xbf16>, vector<32x2048xf32> -> vector<32x2048xf32>
    %11 = arith.maximumf %7, %10 : vector<32x2048xf32>
    %c0_13 = arith.constant 0 : index
    %c3 = arith.constant 3 : index
    %c0_14 = arith.constant 0 : index
    %c0_15 = arith.constant 0 : index
    %12 = vector.load %arg2[%c0_13, %c3, %c0_14, %c0_15] : memref<1x4x32x2048xbf16, #tpu.memory_space<vmem>>, vector<1x1x32x2048xbf16>
    %13 = vector.shape_cast %12 : vector<1x1x32x2048xbf16> to vector<32x2048xbf16>
    %cst_16 = arith.constant dense<0.000000e+00> : vector<32x2048xf32>
    %14 = tpu.matmul %0, %13, %cst_16 {dimension_numbers = #tpu.dot_dimension_numbers<[1], [0], [0], [1], [0, 0, 1, 1], [], []>} : vector<32x32xbf16>, vector<32x2048xbf16>, vector<32x2048xf32> -> vector<32x2048xf32>
    %15 = arith.maximumf %11, %14 : vector<32x2048xf32>
    %cst_17 = arith.constant 0.000000e+00 : f32
    %16 = vector.broadcast %cst_17 : f32 to vector<32x2048xf32>
    %17 = arith.maximumf %15, %16 : vector<32x2048xf32>
    %c0_18 = arith.constant 0 : index
    %c0_19 = arith.constant 0 : index
    %c0_20 = arith.constant 0 : index
    %18 = vector.load %arg4[%c0_18, %c0_19, %c0_20] : memref<1x32x2048xf32, #tpu.memory_space<vmem>>, vector<1x32x2048xf32>
    %19 = vector.shape_cast %18 : vector<1x32x2048xf32> to vector<32x2048xf32>
    %20 = vector.shape_cast %17 : vector<32x2048xf32> to vector<1x32x2048xf32>
    tpu.vector_store %arg4[%c0_18, %c0_19, %c0_20], %20 {strides = array<i32>} : memref<1x32x2048xf32, #tpu.memory_space<vmem>>, vector<1x32x2048xf32>,
    return
  }
  func.func @transform_0(%arg0: i32, %arg1: i32) -> (i32, i32, i32, i32) {
    %c0_i32 = arith.constant 0 : i32
    %c0_i32_0 = arith.constant 0 : i32
    %c0_i32_1 = arith.constant 0 : i32
    return %arg0, %c0_i32, %c0_i32_0, %arg1 : i32, i32, i32, i32
  }
  func.func @transform_1(%arg0: i32, %arg1: i32) -> (i32, i32) {
    %c0_i32 = arith.constant 0 : i32
    %c0_i32_0 = arith.constant 0 : i32
    %c0_i32_1 = arith.constant 0 : i32
    return %c0_i32, %c0_i32_0 : i32, i32
  }
  func.func @transform_2(%arg0: i32, %arg1: i32) -> (i32, i32, i32) {
    %c0_i32 = arith.constant 0 : i32
    %c0_i32_0 = arith.constant 0 : i32
    return %arg0, %c0_i32, %arg1 : i32, i32, i32
  }
}

</mosaic_0001>

<bundles_post_ra>
// kernel: tpu_custom_call.1
= control target key start
LH: loop header
LB: loop body
LE: loop exit
PB: predicated region body
PF: predicated region fallthrough
CT: control target
= control target key end

     0   :  { %s5168_s0 = inlined_call_operand.hbm [shape: bf16[2,4,32,4096], index: 0, kind: input, shape index: {}]   ;;  %s5169_s1 = inlined_call_operand.hbm [shape: bf16[32,32], index: 1, kind: input, shape index: {}]   ;;  %s5170_s2 = inlined_call_operand.hbm [shape: f32[2,32,4096], index: 2, kind: output, shape index: {}]  }
   0x1   :  { %5177 = sst [smem:[#allocation94_spill]] %s5169_s1 }
   0x2   :  { %7 = vsyncpa [#allocation3], 0 }
   0x3   :  { %9 = vsyncpa [#allocation3 + $0x1], 0 }
   0x4   :  { %10 = vsyncpa [#allocation6], 0 }
   0x5   :  { %11 = vsyncpa [#allocation4], 0 }
   0x6   :  { %13 = vsyncpa [#allocation4 + $0x1], 0  ;;  %s3826_s9 = smov 0   ;;  %s3828_s10 = smov 0  }
   0x7   :  { %s3830_s11 = smov 0   ;;  %s3832_s12 = smov 0  }
   0x8   :  { %s3834_s13 = smov 0   ;;  %s3836_s14 = smov 0  }
   0x9   :  { %s3838_s15 = smov 0   ;;  %s3840_s16 = smov 0  }
   0xa LB: > { %5178 = sst [smem:[#allocation11_spill]] %s3773_s9  ;;  %s2648_s17 = sadd.s32 4294967295, %s3801_s16   ;;  %s3801_s16 = sphi %s3840_s16, %s19_s16   ;;  %s3797_s15 = sphi %s3838_s15, %s5385_s15   ;;  %s3793_s14 = sphi %s3836_s14, %s5379_s14   ;;  %s3789_s13 = sphi %s3834_s13, %s5384_s13   ;;  %s3785_s12 = sphi %s3832_s12, %s5378_s12   ;;  %s3781_s11 = sphi %s3830_s11, %s5383_s11   ;;  %s3777_s10 = sphi %s3828_s10, %s5382_s10   ;;  %s3773_s9 = sphi %s3826_s9, %s5381_s9  }
   0xb   : > { %5179 = sst [smem:[#allocation12_spill]] %s3793_s14  ;;  %s2649_s18 = sadd.s32 4294967294, %s3801_s16  }
   0xc   : > { %p53_p0 = scmp.ne.s32.totalorder %s3777_s10, %s3773_s9  ;;  %p3870_p1 = scmp.eq.s32.totalorder %s2648_s17, 0 }
   0xd   : > { %p3874_p2 = scmp.eq.s32.totalorder %s2648_s17, 3  ;;  %p106_p3 = scmp.eq.s32.totalorder %s2649_s18, 3 }
   0xe   : > { %p3880_p4 = por %p3870_p1, %p53_p0  ;;  %p2650_p5 = scmp.ge.s32.totalorder %s3801_s16, 1 }
   0xf   : > { %p3885_p6 = por %p106_p3, %p53_p0  ;;  %p113_p7 = scmp.lt.s32.totalorder %s3801_s16, 5 }
  0x10   : > { %s5185_s1 = sld [smem:[#allocation94_spill]]  ;;  %s3803_s27 = smov [#allocation5]  }
  0x11   : > { %s5183_s22 = scalar_select %p3885_p6, 1, 0 }
  0x12   : > { %p3893_p8 = pnand %p2650_p5, %p113_p7  ;;  %s126_s28 = sshll.u32 %s3803_s27, 4  ;;  %s127_s28 = int_to_ptr.vmem [resolvable:$true] %s126_s28 }
  0x13   : > { %5184 = sst [smem:[#allocation13_spill]] %s5183_s22  ;;  %s5171_s29 = smov 64  }
  0x14   : > { %p3549_p9 = pneg %p3893_p8  ;;  %s3805_s30 = smov 4  }
  0x15   : > { %s28_s3 = sadd.s32 1, %s3793_s14  ;;  %s31_s4 = sadd.s32 1, %s3797_s15 }
  0x16   : > { %s124_s25 = sshll.u32 %s5185_s1, 4  ;;  %p3550_p10 = pnand %p3549_p9, %p3870_p1  ;;  %s125_s25 = int_to_ptr.hbm [resolvable:$true] %s124_s25 }
  0x17   : > { %p29_p11 = scmp.ge.s32.totalorder %s28_s3, 2  ;;  %s40_s5 = sadd.s32 1, %s3781_s11 }
  0x18   : > { %3552 = dma.hbm_to_vmem [thread:$0]  (!%p3550_p10), %s125_s25, 256, %s127_s28, [#allocation6], %s5171_s29, %s5171_s29, %s3805_s30  }
  0x19   : > { %p47_p12 = scmp.ne.s32.totalorder %s3781_s11, %s3777_s10  ;;  %s5387_s3 = smov (%p29_p11, %s28_s3), 0 }
  0x1a   : > { %5187 = sst [smem:[#allocation14_spill]] %s5387_s3  ;;  %s5389_s4 = smov (!%p29_p11, %s31_s4), %s3797_s15 }
  0x1b   : > { %s36_s6 = ssub.s32 %s3793_s14, %s5387_s3  ;;  %p48_p13 = scmp.eq.s32.totalorder %s3801_s16, 0 }
  0x1c   : > { %p33_p0 = scmp.ge.s32.totalorder %s5389_s4, 2  ;;  %p3916_p3 = por %p3874_p2, %p47_p12 }
  0x1d   : > { %p3920_p5 = por %p48_p13, %p47_p12  ;;  %p3562_p7 = scmp.lt.s32.totalorder %s3801_s16, 4 }
  0x1e   : > { %s5391_s4 = smov (%p33_p0, %s5389_s4), 0  ;;  %s140_s17 = sand.u32 1, %s3781_s11  }
  0x1f   : > { %5190 = sst [smem:[#allocation15_spill]] %s5391_s4  ;;  %s2654_s18 = sshll.u32 %s3793_s14, 4 }
  0x20   : > { %s35_s23 = ssub.s32 %s3797_s15, %s5391_s4  ;;  %s2653_s25 = sshll.u32 %s140_s17, 10 }
  0x21   : > { %s37_s24 = sor.u32 %s36_s6, %s35_s23  ;;  %s2655_s20 = sshll.u32 %s3797_s15, 9 }
  0x22   : > { %p38_p9 = scmp.eq.s32.totalorder %s37_s24, 0  ;;  %s144_s27 = scalar_lea.vmem [#allocation2], %s2653_s25 }
  0x23   : > { %s154_s28 = sshll.u32 %s144_s27, 4  ;;  %s149_s29 = sadd.s32 %s2655_s20, %s2654_s18  ;;  %s155_s28 = int_to_ptr.vmem [resolvable:$true] %s154_s28 }
  0x24   : > { %s3933_s30 = scalar_select %p38_p9, %s3781_s11, %s40_s5  }
  0x25   : > { %s2656_s1 = sshll.u32 %s149_s29, 2  ;;  %p3554_p2 = pnand %p3562_p7, %p3920_p5 }
  0x26   : > { %s151_s9 = scalar_lea.hbm %s5168_s0, %s2656_s1  ;;  %s141_s6 = scalar_lea.sflag [#allocation3], %s140_s17 }
  0x27   : > { %s152_s14 = sshll.u32 %s151_s9, 4  ;;  %s3806_s23 = smov 2048   ;;  %s153_s14 = int_to_ptr.hbm [resolvable:$true] %s152_s14 }
  0x28   : > { %s3807_s24 = smov 1024   ;;  %s5191_s4 = smov 64  }
  0x29   : > { %3556 = dma.hbm_to_vmem [thread:$0]  (!%p3554_p2), %s153_s14, 16384, %s155_s28, %s141_s6, %s3806_s23, %s3807_s24, %s5191_s4  }
  0x2a   : > { %166 = sbr.rel (%p3893_p8) target bundleno = 711 (0x2c7), region = 28 }
  0x2f   : > { %s3946_s29 = sand.u32 1, %s3777_s10  }
  0x30   : > { %s2658_s5 = sshll.u32 %s3946_s29, 10  ;;  %s169_s8 = scalar_lea.sflag [#allocation3], %s3946_s29 }
  0x31   : > { %s3950_s22 = scalar_lea.vmem [#allocation2], %s2658_s5 }
  0x32   : > { %3760 = dma.done.wait (%p3880_p4), %s169_s8, 16384  }
  0x33   : > { %3762 = vsyncadd (%p3880_p4), %s169_s8, 4294950912 }
  0x34   : > { %3764 = dma.done.wait (%p3870_p1), [#allocation6], 256  }
  0x35   : > { %3766 = vsyncadd (%p3870_p1), [#allocation6], 4294967040  ;;  %v2735_v0 = vld [vmem:[%s3950_s22 + $0x80] sm:$0xf]  ;;  %v3429_v2 = vld [vmem:[%s3950_s22 + $0x84] sm:$0xf] }
  0x36   : > { %v3437_v1 = vld [vmem:[%s3950_s22 + $0xbc] sm:$0xf0]  ;;  %v2737_v4 = vld [vmem:[%s3950_s22 + $0xc0] sm:$0xf0]  ;;  %v2743_v5 = vld [vmem:[%s3950_s22 + $0x88] sm:$0xf] }
  0x37   : > { %v2736_v3 = vor.u32 %v3437_v1, %v2735_v0  ;;  %v3438_v6 = vld [vmem:[%s3950_s22 + $0xc4] sm:$0xf0]  ;;  %v2740_v7 = vor.u32 %v3429_v2, %v2737_v4  ;;  %v3430_v9 = vld [vmem:[%s3950_s22 + $0x8c] sm:$0xf]  ;;  %v2671_v11 = vld [vmem:[%s3950_s22] sm:$0xf] }
  0x38   : > { %v2744_v8 = vor.u32 %v3438_v6, %v2743_v5  ;;  %v2745_v10 = vld [vmem:[%s3950_s22 + $0xc8] sm:$0xf0]  ;;  %v3421_v13 = vld [vmem:[%s3950_s22 + $0x3c] sm:$0xf0]  ;;  %v3413_v14 = vld [vmem:[%s3950_s22 + $0x4] sm:$0xf] }
  0x39   : > { %421 = vmatpush.bf16.msra.mxu0 %v2736_v3  ;;  %v2748_v12 = vor.u32 %v3430_v9, %v2745_v10  ;;  %v2673_v15 = vld [vmem:[%s3950_s22 + $0x40] sm:$0xf0]  ;;  %440 = vmatpush.bf16.msra.mxu1 %v2740_v7  ;;  %v2672_v16 = vor.u32 %v3421_v13, %v2671_v11  ;;  %v2679_v18 = vld [vmem:[%s3950_s22 + $0x8] sm:$0xf]  ;;  %v3414_v20 = vld [vmem:[%s3950_s22 + $0xc] sm:$0xf] }
  0x3a   : > { %459 = vmatpush.bf16.msra.mxu2 %v2744_v8  ;;  %v2676_v17 = vor.u32 %v3413_v14, %v2673_v15  ;;  %v3422_v19 = vld [vmem:[%s3950_s22 + $0x44] sm:$0xf0]  ;;  %v2681_v22 = vld [vmem:[%s3950_s22 + $0x48] sm:$0xf0]  ;;  %v3976_v23 = vld [vmem:[#allocation5] sm:$0xff]  ;;  %vm408_vm0 = vcmask 261120  }
  0x3b   : > { %478 = vmatpush.bf16.msra.mxu3 %v2748_v12  ;;  %v2680_v21 = vor.u32 %v3422_v19, %v2679_v18  ;;  %v2759_v24 = vld [vmem:[%s3950_s22 + $0x98] sm:$0xf]  ;;  %v2684_v25 = vor.u32 %v3414_v20, %v2681_v22  ;;  %v3432_v27 = vld [vmem:[%s3950_s22 + $0x9c] sm:$0xf]  ;;  %v2751_v31 = vld [vmem:[%s3950_s22 + $0x90] sm:$0xf] }
  0x3c   : > { %v3440_v26 = vld [vmem:[%s3950_s22 + $0xd4] sm:$0xf0]  ;;  %v2761_v28 = vld [vmem:[%s3950_s22 + $0xd8] sm:$0xf0]  ;;  %v3439_v32 = vld [vmem:[%s3950_s22 + $0xcc] sm:$0xf0] }
  0x3d   : > { %422 = vmatpush.bf16.msra.mxu0 %v2672_v16  ;;  %v2760_v29 = vor.u32 %v3440_v26, %v2759_v24  ;;  %v2764_v30 = vor.u32 %v3432_v27, %v2761_v28  ;;  %v3431_v33 = vld [vmem:[%s3950_s22 + $0x94] sm:$0xf]  ;;  %441 = vmatpush.bf16.msra.mxu1 %v2676_v17  ;;  %v2752_v34 = vor.u32 %v3439_v32, %v2751_v31  ;;  %v2695_v36 = vld [vmem:[%s3950_s22 + $0x18] sm:$0xf]  ;;  %v3416_v39 = vld [vmem:[%s3950_s22 + $0x1c] sm:$0xf] }
  0x3e   : > { %460 = vmatpush.bf16.msra.mxu2 %v2680_v21  ;;  %v2753_v35 = vld [vmem:[%s3950_s22 + $0xd0] sm:$0xf0]  ;;  %v3424_v38 = vld [vmem:[%s3950_s22 + $0x54] sm:$0xf0]  ;;  %v2697_v40 = vld [vmem:[%s3950_s22 + $0x58] sm:$0xf0] }
  0x3f   : > { %479 = vmatpush.bf16.msra.mxu3 %v2684_v25  ;;  %v2756_v37 = vor.u32 %v3431_v33, %v2753_v35  ;;  %v2696_v41 = vor.u32 %v3424_v38, %v2695_v36  ;;  %v2700_v42 = vor.u32 %v3416_v39, %v2697_v40  ;;  %v2687_v43 = vld [vmem:[%s3950_s22 + $0x10] sm:$0xf]  ;;  %v3415_v45 = vld [vmem:[%s3950_s22 + $0x14] sm:$0xf]  ;;  %v2775_v48 = vld [vmem:[%s3950_s22 + $0xa8] sm:$0xf] }
  0x40   : > { %2797 = vmatmul.msk.bf16.vlgmr.msra.gmra.mxu0 %vm408_vm0, %v3976_v23  ;;  %v3423_v44 = vld [vmem:[%s3950_s22 + $0x4c] sm:$0xf0]  ;;  %2799 = vmatmul.msk.bf16.vlgmr.msra.gmra.mxu1 %vm408_vm0, %v3976_v23  ;;  %v2689_v46 = vld [vmem:[%s3950_s22 + $0x50] sm:$0xf0]  ;;  %v3442_v49 = vld [vmem:[%s3950_s22 + $0xe4] sm:$0xf0] }
  0x41   : > { %2801 = vmatmul.msk.bf16.vlgmr.msra.gmra.mxu2 %vm408_vm0, %v3976_v23  ;;  %497 = vmatpush.bf16.msrb.mxu0 %v2752_v34  ;;  %v2688_v47 = vor.u32 %v3423_v44, %v2687_v43  ;;  %v3434_v50 = vld [vmem:[%s3950_s22 + $0xac] sm:$0xf]  ;;  %v2692_v51 = vor.u32 %v3415_v45, %v2689_v46  ;;  %v2776_v52 = vor.u32 %v3442_v49, %v2775_v48  ;;  %v2767_v54 = vld [vmem:[%s3950_s22 + $0xa0] sm:$0xf]  ;;  %v3433_v58 = vld [vmem:[%s3950_s22 + $0xa4] sm:$0xf] }
  0x42   : > { %535 = vmatpush.bf16.msrb.mxu2 %v2760_v29  ;;  %2803 = vmatmul.msk.bf16.vlgmr.msra.gmra.mxu3 %vm408_vm0, %v3976_v23  ;;  %v2777_v53 = vld [vmem:[%s3950_s22 + $0xe8] sm:$0xf0]  ;;  %v3441_v55 = vld [vmem:[%s3950_s22 + $0xdc] sm:$0xf0]  ;;  %v2769_v59 = vld [vmem:[%s3950_s22 + $0xe0] sm:$0xf0] }
  0x43   : > { %554 = vmatpush.bf16.msrb.mxu3 %v2764_v30  ;;  %516 = vmatpush.bf16.msrb.mxu1 %v2756_v37  ;;  %v2780_v56 = vor.u32 %v3434_v50, %v2777_v53  ;;  %v2768_v57 = vor.u32 %v3441_v55, %v2767_v54  ;;  %v2772_v60 = vor.u32 %v3433_v58, %v2769_v59  ;;  %v4010_v61 = vld [vmem:[#allocation5 + $0x8] sm:$0xff]  ;;  %v2703_v3 = vld [vmem:[%s3950_s22 + $0x20] sm:$0xf]  ;;  %v3417_v7 = vld [vmem:[%s3950_s22 + $0x24] sm:$0xf]  ;;  %s2660_s1 = sshll.u32 %s3946_s29, 9 }
  0x44   : > { %v2711_v62 = vld [vmem:[%s3950_s22 + $0x28] sm:$0xf]  ;;  %v3418_v0 = vld [vmem:[%s3950_s22 + $0x2c] sm:$0xf]  ;;  %v3425_v4 = vld [vmem:[%s3950_s22 + $0x5c] sm:$0xf0] }
  0x45   : > { %498 = vmatpush.bf16.msrb.mxu0 %v2688_v47  ;;  %v3426_v63 = vld [vmem:[%s3950_s22 + $0x64] sm:$0xf0]  ;;  %v2713_v2 = vld [vmem:[%s3950_s22 + $0x68] sm:$0xf0]  ;;  %v2704_v6 = vor.u32 %v3425_v4, %v2703_v3  ;;  %v2705_v8 = vld [vmem:[%s3950_s22 + $0x60] sm:$0xf0] }
  0x46   : > { %536 = vmatpush.bf16.msrb.mxu2 %v2696_v41  ;;  %v2712_v1 = vor.u32 %v3426_v63, %v2711_v62  ;;  %v2716_v5 = vor.u32 %v3418_v0, %v2713_v2  ;;  %v2708_v9 = vor.u32 %v3417_v7, %v2705_v8  ;;  %v2791_v10 = vld [vmem:[%s3950_s22 + $0xb8] sm:$0xf]  ;;  %v3436_v12 = vld [vmem:[%s3950_s22 + $0xbc] sm:$0xf]  ;;  %v2783_v15 = vld [vmem:[%s3950_s22 + $0xb0] sm:$0xf] }
  0x47   : > { %555 = vmatpush.bf16.msrb.mxu3 %v2700_v42  ;;  %517 = vmatpush.bf16.msrb.mxu1 %v2692_v51  ;;  %v3444_v11 = vld [vmem:[%s3950_s22 + $0xf4] sm:$0xf0]  ;;  %v2793_v14 = vld [vmem:[%s3950_s22 + $0xf8] sm:$0xf0]  ;;  %v3443_v16 = vld [vmem:[%s3950_s22 + $0xec] sm:$0xf0] }
  0x48   : > { %v2792_v13 = vor.u32 %v3444_v11, %v2791_v10  ;;  %v2796_v17 = vor.u32 %v3436_v12, %v2793_v14  ;;  %v2784_v18 = vor.u32 %v3443_v16, %v2783_v15  ;;  %v3435_v19 = vld [vmem:[%s3950_s22 + $0xb4] sm:$0xf]  ;;  %v2727_v22 = vld [vmem:[%s3950_s22 + $0x38] sm:$0xf]  ;;  %v3420_v25 = vld [vmem:[%s3950_s22 + $0x3c] sm:$0xf] }
  0x49   : > { %573 = vmatpush.bf16.msra.mxu0 %v2768_v57  ;;  %v2785_v20 = vld [vmem:[%s3950_s22 + $0xf0] sm:$0xf0]  ;;  %v3428_v24 = vld [vmem:[%s3950_s22 + $0x74] sm:$0xf0]  ;;  %v2729_v27 = vld [vmem:[%s3950_s22 + $0x78] sm:$0xf0] }
  0x4a   : > { %611 = vmatpush.bf16.msra.mxu2 %v2776_v52  ;;  %v2788_v21 = vor.u32 %v3435_v19, %v2785_v20  ;;  %v2728_v26 = vor.u32 %v3428_v24, %v2727_v22  ;;  %v2719_v28 = vld [vmem:[%s3950_s22 + $0x30] sm:$0xf]  ;;  %v2732_v30 = vor.u32 %v3420_v25, %v2729_v27  ;;  %v3419_v32 = vld [vmem:[%s3950_s22 + $0x34] sm:$0xf]  ;;  %v2935_v35 = vld [vmem:[%s3950_s22 + $0x188] sm:$0xf] }
  0x4b   : > { %630 = vmatpush.bf16.msra.mxu3 %v2780_v56  ;;  %592 = vmatpush.bf16.msra.mxu1 %v2772_v60  ;;  %v3427_v29 = vld [vmem:[%s3950_s22 + $0x6c] sm:$0xf0]  ;;  %v2721_v33 = vld [vmem:[%s3950_s22 + $0x70] sm:$0xf0]  ;;  %v3470_v36 = vld [vmem:[%s3950_s22 + $0x1c4] sm:$0xf0] }
  0x4c   : > { %v2720_v31 = vor.u32 %v3427_v29, %v2719_v28  ;;  %v2724_v34 = vor.u32 %v3419_v32, %v2721_v33  ;;  %v3462_v37 = vld [vmem:[%s3950_s22 + $0x18c] sm:$0xf]  ;;  %v2936_v38 = vor.u32 %v3470_v36, %v2935_v35  ;;  %v2927_v40 = vld [vmem:[%s3950_s22 + $0x180] sm:$0xf]  ;;  %v3461_v44 = vld [vmem:[%s3950_s22 + $0x184] sm:$0xf] }
  0x4d   : > { %574 = vmatpush.bf16.msra.mxu0 %v2704_v6  ;;  %v2937_v39 = vld [vmem:[%s3950_s22 + $0x1c8] sm:$0xf0]  ;;  %v3469_v41 = vld [vmem:[%s3950_s22 + $0x1bc] sm:$0xf0]  ;;  %v2929_v45 = vld [vmem:[%s3950_s22 + $0x1c0] sm:$0xf0] }
  0x4e   : > { %612 = vmatpush.bf16.msra.mxu2 %v2712_v1  ;;  %v2940_v42 = vor.u32 %v3462_v37, %v2937_v39  ;;  %v2928_v43 = vor.u32 %v3469_v41, %v2927_v40  ;;  %v2932_v46 = vor.u32 %v3461_v44, %v2929_v45  ;;  %v2871_v47 = vld [vmem:[%s3950_s22 + $0x108] sm:$0xf]  ;;  %v3446_v49 = vld [vmem:[%s3950_s22 + $0x10c] sm:$0xf]  ;;  %v2863_v52 = vld [vmem:[%s3950_s22 + $0x100] sm:$0xf] }
  0x4f   : > { %631 = vmatpush.bf16.msra.mxu3 %v2716_v5  ;;  %593 = vmatpush.bf16.msra.mxu1 %v2708_v9  ;;  %v3454_v48 = vld [vmem:[%s3950_s22 + $0x144] sm:$0xf0]  ;;  %v2873_v51 = vld [vmem:[%s3950_s22 + $0x148] sm:$0xf0]  ;;  %v3453_v53 = vld [vmem:[%s3950_s22 + $0x13c] sm:$0xf0] }
  0x50   : > { %2798 = vmatmul.msk.bf16.gmra.mxu0 %vm408_vm0, %v4010_v61  ;;  %2800 = vmatmul.msk.bf16.gmra.mxu1 %vm408_vm0, %v4010_v61  ;;  %v2872_v50 = vor.u32 %v3454_v48, %v2871_v47  ;;  %v2876_v54 = vor.u32 %v3446_v49, %v2873_v51  ;;  %v2864_v55 = vor.u32 %v3453_v53, %v2863_v52  ;;  %v3445_v56 = vld [vmem:[%s3950_s22 + $0x104] sm:$0xf]  ;;  %v2951_v59 = vld [vmem:[%s3950_s22 + $0x198] sm:$0xf]  ;;  %v3464_v62 = vld [vmem:[%s3950_s22 + $0x19c] sm:$0xf] }
  0x51   : > { %2802 = vmatmul.msk.bf16.gmra.mxu2 %vm408_vm0, %v4010_v61  ;;  %v2865_v57 = vld [vmem:[%s3950_s22 + $0x140] sm:$0xf0]  ;;  %v3472_v60 = vld [vmem:[%s3950_s22 + $0x1d4] sm:$0xf0]  ;;  %v2953_v0 = vld [vmem:[%s3950_s22 + $0x1d8] sm:$0xf0] }
  0x52   : > { %2804 = vmatmul.msk.bf16.gmra.mxu3 %vm408_vm0, %v4010_v61  ;;  %v2868_v58 = vor.u32 %v3445_v56, %v2865_v57  ;;  %v2952_v63 = vor.u32 %v3472_v60, %v2951_v59  ;;  %v2956_v1 = vor.u32 %v3464_v62, %v2953_v0  ;;  %v2943_v2 = vld [vmem:[%s3950_s22 + $0x190] sm:$0xf]  ;;  %v3463_v4 = vld [vmem:[%s3950_s22 + $0x194] sm:$0xf]  ;;  %v2887_v8 = vld [vmem:[%s3950_s22 + $0x118] sm:$0xf] }
  0x53   : > { %v3471_v3 = vld [vmem:[%s3950_s22 + $0x1cc] sm:$0xf0]  ;;  %v2945_v6 = vld [vmem:[%s3950_s22 + $0x1d0] sm:$0xf0]  ;;  %v3456_v9 = vld [vmem:[%s3950_s22 + $0x154] sm:$0xf0] }
  0x54   : > { %v2944_v5 = vor.u32 %v3471_v3, %v2943_v2  ;;  %v2948_v7 = vor.u32 %v3463_v4, %v2945_v6  ;;  %v3448_v10 = vld [vmem:[%s3950_s22 + $0x11c] sm:$0xf]  ;;  %v2888_v11 = vor.u32 %v3456_v9, %v2887_v8  ;;  %v2879_v14 = vld [vmem:[%s3950_s22 + $0x110] sm:$0xf]  ;;  %v3447_v16 = vld [vmem:[%s3950_s22 + $0x114] sm:$0xf] }
  0x55   : > { %v2889_v12 = vld [vmem:[%s3950_s22 + $0x158] sm:$0xf0]  ;;  %v3455_v15 = vld [vmem:[%s3950_s22 + $0x14c] sm:$0xf0]  ;;  %v2967_v22 = vld [vmem:[%s3950_s22 + $0x1a8] sm:$0xf] }
  0x56   : > { %v3474_v24 = vld [vmem:[%s3950_s22 + $0x1e4] sm:$0xf0]  ;;  %v3466_v25 = vld [vmem:[%s3950_s22 + $0x1ac] sm:$0xf]  ;;  %v2959_v33 = vld [vmem:[%s3950_s22 + $0x1a0] sm:$0xf] }
  0x57   : > { %v2969_v27 = vld [vmem:[%s3950_s22 + $0x1e8] sm:$0xf0]  ;;  %v3465_v35 = vld [vmem:[%s3950_s22 + $0x1a4] sm:$0xf]  ;;  %v3458_v44 = vld [vmem:[%s3950_s22 + $0x164] sm:$0xf0] }
  0x58   : > { %v2972_v29 = vor.u32 %v3466_v25, %v2969_v27  ;;  %v2961_v37 = vld [vmem:[%s3950_s22 + $0x1e0] sm:$0xf0]  ;;  %v3450_v45 = vld [vmem:[%s3950_s22 + $0x12c] sm:$0xf]  ;;  %v2895_v53 = vld [vmem:[%s3950_s22 + $0x120] sm:$0xf] }
  0x59   : > { %v2905_v47 = vld [vmem:[%s3950_s22 + $0x168] sm:$0xf0]  ;;  %v2897_v57 = vld [vmem:[%s3950_s22 + $0x160] sm:$0xf0]  ;;  %v2983_v0 = vld [vmem:[%s3950_s22 + $0x1b8] sm:$0xf] }
  0x5a   : > { %v2908_v49 = vor.u32 %v3450_v45, %v2905_v47  ;;  %v3468_v2 = vld [vmem:[%s3950_s22 + $0x1bc] sm:$0xf]  ;;  %v2913_v45 = vld [vmem:[%s3950_s22 + $0x170] sm:$0xf0]  ;;  %s4995_s9 = scalar_lea.vmem [#allocation7], %s2660_s1  ;;  %s3406_s14 = sshll.u32 %s3785_s12, 4 }
  0x5b   : > { %v2985_v4 = vld [vmem:[%s3950_s22 + $0x1f8] sm:$0xf0]  ;;  %s3407_s19 = sshll.u32 %s3789_s13, 7  ;;  %s2545_s4 = sshll.u32 %s4995_s9, 4  ;;  %s2546_s4 = int_to_ptr.vmem [resolvable:$true] %s2545_s4 }
  0x5c   : > { %v2988_v6 = vor.u32 %v3468_v2, %v2985_v4  ;;  %v3452_v25 = vld [vmem:[%s3950_s22 + $0x13c] sm:$0xf]  ;;  %s2542_s21 = sadd.s32 %s3407_s19, %s3406_s14  ;;  %s2531_s18 = scalar_lea.sflag [#allocation4], %s3946_s29 }
  0x5d   : > { %v2921_v27 = vld [vmem:[%s3950_s22 + $0x178] sm:$0xf0]  ;;  %s3408_s12 = sshll.u32 %s2542_s21, 3  ;;  %s3719_s6 = scalar_lea.hbm %s5170_s2, 2048 }
  0x5e   : > { %s2544_s3 = scalar_lea.hbm %s5170_s2, %s3408_s12 }
  0x5f   : > { %s2547_s17 = sshll.u32 %s2544_s3, 4  ;;  %s2548_s17 = int_to_ptr.hbm [resolvable:$true] %s2547_s17 }
  0x60   : > { %2805 = vmatmul.msk.bf16.vlgmr.msrb.gmra.mxu0 %vm408_vm0, %v3976_v23  ;;  %2807 = vmatmul.msk.bf16.vlgmr.msrb.gmra.mxu1 %vm408_vm0, %v3976_v23  ;;  %s3713_s25 = sshra.s32 %s2548_s17, 4  ;;  %s3714_s25 = int_to_ptr.hbm [resolvable:$true] %s3713_s25 }
  0x61   : > { %2809 = vmatmul.msk.bf16.vlgmr.msrb.gmra.mxu2 %vm408_vm0, %v3976_v23  ;;  %649 = vmatpush.bf16.msrb.mxu0 %v2784_v18  ;;  %v2881_v18 = vld [vmem:[%s3950_s22 + $0x150] sm:$0xf0]  ;;  %s3715_s20 = scalar_lea.hbm %s3714_s25, 512  ;;  %p3720_p10 = scmp.lt.s32.totalorder %s3714_s25, %s5170_s2 }
  0x62   : > { %2811 = vmatmul.msk.bf16.vlgmr.msrb.gmra.mxu3 %vm408_vm0, %v3976_v23  ;;  %687 = vmatpush.bf16.msrb.mxu2 %v2792_v13  ;;  %v2892_v13 = vor.u32 %v3448_v10, %v2889_v12  ;;  %v2884_v19 = vor.u32 %v3447_v16, %v2881_v18  ;;  %v2975_v10 = vld [vmem:[%s3950_s22 + $0x1b0] sm:$0xf]  ;;  %v3467_v12 = vld [vmem:[%s3950_s22 + $0x1b4] sm:$0xf]  ;;  %p3716_p1 = scmp.ne.s32.totalorder %s3714_s25, %s3715_s20  ;;  %p3721_p11 = scmp.lt.s32.totalorder %s3719_s6, %s3715_s20 }
  0x63   : > { %706 = vmatpush.bf16.msrb.mxu3 %v2796_v17  ;;  %668 = vmatpush.bf16.msrb.mxu1 %v2788_v21  ;;  %v2880_v17 = vor.u32 %v3455_v15, %v2879_v14  ;;  %v2977_v14 = vld [vmem:[%s3950_s22 + $0x1f0] sm:$0xf0] }
  0x64   : > { %v2980_v15 = vor.u32 %v3467_v12, %v2977_v14  ;;  %v3493_v12 = vld [vmem:[%s3950_s22 + $0x284] sm:$0xf]  ;;  %p3717_p4 = pnand %p3716_p1, %p3916_p3  ;;  %p3722_p12 = por %p3721_p11, %p3720_p10 }
  0x65   : > { %650 = vmatpush.bf16.msrb.mxu0 %v2720_v31  ;;  %v3121_v14 = vld [vmem:[%s3950_s22 + $0x2c0] sm:$0xf0] }
  0x66   : > { %688 = vmatpush.bf16.msrb.mxu2 %v2728_v26  ;;  %v2968_v26 = vor.u32 %v3474_v24, %v2967_v22  ;;  %v2919_v22 = vld [vmem:[%s3950_s22 + $0x138] sm:$0xf]  ;;  %p3718_p8 = pneg %p3717_p4 }
  0x67   : > { %707 = vmatpush.bf16.msrb.mxu3 %v2732_v30  ;;  %669 = vmatpush.bf16.msrb.mxu1 %v2724_v34  ;;  %v3473_v34 = vld [vmem:[%s3950_s22 + $0x1dc] sm:$0xf0]  ;;  %v3460_v24 = vld [vmem:[%s3950_s22 + $0x174] sm:$0xf0] }
  0x68   : > { %v2960_v36 = vor.u32 %v3473_v34, %v2959_v33  ;;  %v2924_v33 = vor.u32 %v3452_v25, %v2921_v27  ;;  %v3063_v27 = vld [vmem:[%s3950_s22 + $0x208] sm:$0xf]  ;;  %p3723_p13 = pnand %p3722_p12, %p3718_p8 }
  0x70   : > { %2806 = vmatmul.msk.bf16.gmra.mxu0 %vm408_vm0, %v4010_v61  ;;  %2808 = vmatmul.msk.bf16.gmra.mxu1 %vm408_vm0, %v4010_v61 }
  0x71   : > { %2810 = vmatmul.msk.bf16.gmra.mxu2 %vm408_vm0, %v4010_v61 }
  0x72   : > { %2812 = vmatmul.msk.bf16.gmra.mxu3 %vm408_vm0, %v4010_v61 }
  0x80   : > { %2813 = vmatmul.msk.bf16.vlgmr.msra.gmra.mxu0 %vm408_vm0, %v3976_v23  ;;  %2815 = vmatmul.msk.bf16.vlgmr.msra.gmra.mxu1 %vm408_vm0, %v3976_v23 }
  0x81   : > { %2817 = vmatmul.msk.bf16.vlgmr.msra.gmra.mxu2 %vm408_vm0, %v3976_v23  ;;  %918 = vmatpush.bf16.msra.mxu0 %v2928_v43  ;;  %v2903_v43 = vld [vmem:[%s3950_s22 + $0x128] sm:$0xf] }
  0x82   : > { %2819 = vmatmul.msk.bf16.vlgmr.msra.gmra.mxu3 %vm408_vm0, %v3976_v23  ;;  %956 = vmatpush.bf16.msra.mxu2 %v2936_v38  ;;  %v2964_v38 = vor.u32 %v3465_v35, %v2961_v37  ;;  %v2911_v37 = vld [vmem:[%s3950_s22 + $0x130] sm:$0xf] }
  0x83   : > { %975 = vmatpush.bf16.msra.mxu3 %v2940_v42  ;;  %937 = vmatpush.bf16.msra.mxu1 %v2932_v46  ;;  %v2904_v46 = vor.u32 %v3458_v44, %v2903_v43  ;;  %v3451_v43 = vld [vmem:[%s3950_s22 + $0x134] sm:$0xf] }
  0x85   : > { %919 = vmatpush.bf16.msra.mxu0 %v2864_v55  ;;  %v3449_v55 = vld [vmem:[%s3950_s22 + $0x124] sm:$0xf] }
  0x86   : > { %957 = vmatpush.bf16.msra.mxu2 %v2872_v50 }
  0x87   : > { %976 = vmatpush.bf16.msra.mxu3 %v2876_v54  ;;  %938 = vmatpush.bf16.msra.mxu1 %v2868_v58  ;;  %v3457_v54 = vld [vmem:[%s3950_s22 + $0x15c] sm:$0xf0]  ;;  %v2900_v58 = vor.u32 %v3449_v55, %v2897_v57  ;;  %v3127_v55 = vld [vmem:[%s3950_s22 + $0x288] sm:$0xf]  ;;  %v3494_v57 = vld [vmem:[%s3950_s22 + $0x28c] sm:$0xf] }
  0x88   : > { %v2896_v56 = vor.u32 %v3457_v54, %v2895_v53 }
  0x90   : > { %2814 = vmatmul.msk.bf16.gmra.mxu0 %vm408_vm0, %v4010_v61  ;;  %2816 = vmatmul.msk.bf16.gmra.mxu1 %vm408_vm0, %v4010_v61 }
  0x91   : > { %2818 = vmatmul.msk.bf16.gmra.mxu2 %vm408_vm0, %v4010_v61 }
  0x92   : > { %2820 = vmatmul.msk.bf16.gmra.mxu3 %vm408_vm0, %v4010_v61 }
  0xa0   : > { %2821 = vmatmul.msk.bf16.vlgmr.msrb.gmra.mxu0 %vm408_vm0, %v3976_v23  ;;  %2823 = vmatmul.msk.bf16.vlgmr.msrb.gmra.mxu1 %vm408_vm0, %v3976_v23 }
  0xa1   : > { %2825 = vmatmul.msk.bf16.vlgmr.msrb.gmra.mxu2 %vm408_vm0, %v3976_v23  ;;  %994 = vmatpush.bf16.msrb.mxu0 %v2944_v5 }
  0xa2   : > { %2827 = vmatmul.msk.bf16.vlgmr.msrb.gmra.mxu3 %vm408_vm0, %v3976_v23  ;;  %1032 = vmatpush.bf16.msrb.mxu2 %v2952_v63 }
  0xa3   : > { %1051 = vmatpush.bf16.msrb.mxu3 %v2956_v1  ;;  %1013 = vmatpush.bf16.msrb.mxu1 %v2948_v7  ;;  %v3476_v1 = vld [vmem:[%s3950_s22 + $0x1f4] sm:$0xf0] }
  0xa4   : > { %v2984_v3 = vor.u32 %v3476_v1, %v2983_v0  ;;  %v3129_v0 = vld [vmem:[%s3950_s22 + $0x2c8] sm:$0xf0] }
  0xa5   : > { %995 = vmatpush.bf16.msrb.mxu0 %v2880_v17  ;;  %v3132_v2 = vor.u32 %v3494_v57, %v3129_v0  ;;  %v3055_v57 = vld [vmem:[%s3950_s22 + $0x200] sm:$0xf]  ;;  %v3477_v0 = vld [vmem:[%s3950_s22 + $0x204] sm:$0xf] }
  0xa6   : > { %1033 = vmatpush.bf16.msrb.mxu2 %v2888_v11  ;;  %v3475_v11 = vld [vmem:[%s3950_s22 + $0x1ec] sm:$0xf0] }
  0xa7   : > { %1052 = vmatpush.bf16.msrb.mxu3 %v2892_v13  ;;  %1014 = vmatpush.bf16.msrb.mxu1 %v2884_v19  ;;  %v2976_v13 = vor.u32 %v3475_v11, %v2975_v10  ;;  %v3119_v10 = vld [vmem:[%s3950_s22 + $0x280] sm:$0xf] }
  0xa8   : > { %v3501_v11 = vld [vmem:[%s3950_s22 + $0x2bc] sm:$0xf0] }
  0xb0   : > { %2822 = vmatmul.msk.bf16.gmra.mxu0 %vm408_vm0, %v4010_v61  ;;  %2824 = vmatmul.msk.bf16.gmra.mxu1 %vm408_vm0, %v4010_v61 }
  0xb1   : > { %2826 = vmatmul.msk.bf16.gmra.mxu2 %vm408_vm0, %v4010_v61 }
  0xb2   : > { %2828 = vmatmul.msk.bf16.gmra.mxu3 %vm408_vm0, %v4010_v61 }
  0xbd   : > { %v4124_v20 = vpop.f32.mrf.mxu0  ;;  %v4126_v21 = vpop.f32.mrf.mxu1 }
  0xc0   : > { %2989 = vmatmul.msk.bf16.vlgmr.msra.gmra.mxu0 %vm408_vm0, %v3976_v23  ;;  %2991 = vmatmul.msk.bf16.vlgmr.msra.gmra.mxu1 %vm408_vm0, %v3976_v23 }
  0xc1   : > { %2993 = vmatmul.msk.bf16.vlgmr.msra.gmra.mxu2 %vm408_vm0, %v3976_v23  ;;  %1070 = vmatpush.bf16.msra.mxu0 %v2960_v36 }
  0xc2   : > { %2995 = vmatmul.msk.bf16.vlgmr.msra.gmra.mxu3 %vm408_vm0, %v3976_v23  ;;  %1108 = vmatpush.bf16.msra.mxu2 %v2968_v26  ;;  %v2920_v26 = vor.u32 %v3460_v24, %v2919_v22 }
  0xc3   : > { %1127 = vmatpush.bf16.msra.mxu3 %v2972_v29  ;;  %1089 = vmatpush.bf16.msra.mxu1 %v2964_v38  ;;  %v3459_v38 = vld [vmem:[%s3950_s22 + $0x16c] sm:$0xf0] }
  0xc4   : > { %v4140_v28 = vpop.f32.mrf.mxu2  ;;  %v2912_v44 = vor.u32 %v3459_v38, %v2911_v37  ;;  %v3478_v37 = vld [vmem:[%s3950_s22 + $0x20c] sm:$0xf] }
  0xc5   : > { %v4142_v30 = vpop.f32.mrf.mxu3  ;;  %v4144_v31 = vpop.f32.mrf.mxu0  ;;  %1071 = vmatpush.bf16.msra.mxu0 %v2896_v56  ;;  %v3502_v56 = vld [vmem:[%s3950_s22 + $0x2c4] sm:$0xf0] }
  0xc6   : > { %v4146_v32 = vpop.f32.mrf.mxu1  ;;  %1109 = vmatpush.bf16.msra.mxu2 %v2904_v46  ;;  %v2916_v46 = vor.u32 %v3451_v43, %v2913_v45  ;;  %v3065_v43 = vld [vmem:[%s3950_s22 + $0x248] sm:$0xf0] }
  0xc7   : > { %1128 = vmatpush.bf16.msra.mxu3 %v2908_v49  ;;  %1090 = vmatpush.bf16.msra.mxu1 %v2900_v58  ;;  %v3128_v58 = vor.u32 %v3502_v56, %v3127_v55  ;;  %v3068_v45 = vor.u32 %v3478_v37, %v3065_v43  ;;  %v3496_v37 = vld [vmem:[%s3950_s22 + $0x29c] sm:$0xf] }
  0xc8   : > { %v3145_v43 = vld [vmem:[%s3950_s22 + $0x2d8] sm:$0xf0] }
  0xcc   : > { %v4152_v39 = vpop.f32.mrf.mxu2 }
  0xcd   : > { %v4154_v40 = vpop.f32.mrf.mxu3  ;;  %v4156_v41 = vpop.f32.mrf.mxu0 }
  0xce   : > { %v4158_v42 = vpop.f32.mrf.mxu1 }
  0xd0   : > { %2990 = vmatmul.msk.bf16.gmra.mxu0 %vm408_vm0, %v4010_v61  ;;  %2992 = vmatmul.msk.bf16.gmra.mxu1 %vm408_vm0, %v4010_v61 }
  0xd1   : > { %2994 = vmatmul.msk.bf16.gmra.mxu2 %vm408_vm0, %v4010_v61 }
  0xd2   : > { %2996 = vmatmul.msk.bf16.gmra.mxu3 %vm408_vm0, %v4010_v61 }
  0xd4   : > { %v4172_v48 = vpop.f32.mrf.mxu2 }
  0xd5   : > { %v4174_v50 = vpop.f32.mrf.mxu3  ;;  %v4176_v51 = vpop.f32.mrf.mxu0 }
  0xd6   : > { %v4178_v52 = vpop.f32.mrf.mxu1 }
  0xdc   : > { %v4184_v59 = vpop.f32.mrf.mxu2 }
  0xdd   : > { %v4186_v60 = vpop.f32.mrf.mxu3  ;;  %v4188_v62 = vpop.f32.mrf.mxu0 }
  0xde   : > { %v4190_v63 = vpop.f32.mrf.mxu1 }
  0xe0   : > { %2997 = vmatmul.msk.bf16.vlgmr.msrb.gmra.mxu0 %vm408_vm0, %v3976_v23  ;;  %2999 = vmatmul.msk.bf16.vlgmr.msrb.gmra.mxu1 %vm408_vm0, %v3976_v23 }
  0xe1   : > { %3001 = vmatmul.msk.bf16.vlgmr.msrb.gmra.mxu2 %vm408_vm0, %v3976_v23  ;;  %1146 = vmatpush.bf16.msrb.mxu0 %v2976_v13  ;;  %v3120_v13 = vor.u32 %v3501_v11, %v3119_v10  ;;  %v3057_v10 = vld [vmem:[%s3950_s22 + $0x240] sm:$0xf0] }
  0xe2   : > { %3003 = vmatmul.msk.bf16.vlgmr.msrb.gmra.mxu3 %vm408_vm0, %v3976_v23  ;;  %1184 = vmatpush.bf16.msrb.mxu2 %v2984_v3  ;;  %v3060_v11 = vor.u32 %v3477_v0, %v3057_v10  ;;  %v3135_v10 = vld [vmem:[%s3950_s22 + $0x290] sm:$0xf] }
  0xe3   : > { %1203 = vmatpush.bf16.msrb.mxu3 %v2988_v6  ;;  %1165 = vmatpush.bf16.msrb.mxu1 %v2980_v15  ;;  %v3124_v15 = vor.u32 %v3493_v12, %v3121_v14 }
  0xe4   : > { %v4204_v5 = vpop.f32.mrf.mxu2 }
  0xe5   : > { %v4206_v7 = vpop.f32.mrf.mxu3  ;;  %v4208_v8 = vpop.f32.mrf.mxu0  ;;  %1147 = vmatpush.bf16.msrb.mxu0 %v2912_v44 }
  0xe6   : > { %v4210_v9 = vpop.f32.mrf.mxu1  ;;  %1185 = vmatpush.bf16.msrb.mxu2 %v2920_v26 }
  0xe7   : > { %1204 = vmatpush.bf16.msrb.mxu3 %v2924_v33  ;;  %1166 = vmatpush.bf16.msrb.mxu1 %v2916_v46  ;;  %v3486_v33 = vld [vmem:[%s3950_s22 + $0x244] sm:$0xf0] }
  0xe8   : > { %v3064_v38 = vor.u32 %v3486_v33, %v3063_v27  ;;  %v3143_v27 = vld [vmem:[%s3950_s22 + $0x298] sm:$0xf] }
  0xe9   : > { %v3504_v33 = vld [vmem:[%s3950_s22 + $0x2d4] sm:$0xf0] }
  0xec   : > { %v4216_v16 = vpop.f32.mrf.mxu2 }
  0xed   : > { %v4218_v17 = vpop.f32.mrf.mxu3  ;;  %v4220_v18 = vpop.f32.mrf.mxu0 }
  0xee   : > { %5192 = vst [vmem:[#allocation16_spill] sm:$0xff] %v4218_v17  ;;  %v4222_v19 = vpop.f32.mrf.mxu1  ;;  %v3265_v17 = vld [vmem:[%s3950_s22 + $0x350] sm:$0xf0] }
  0xef   : > { %5193 = vst [vmem:[#allocation17_spill] sm:$0xff] %v4220_v18 }
  0xf0   : > { %5194 = vst [vmem:[#allocation18_spill] sm:$0xff] %v4222_v19  ;;  %2998 = vmatmul.msk.bf16.gmra.mxu0 %vm408_vm0, %v4010_v61  ;;  %3000 = vmatmul.msk.bf16.gmra.mxu1 %vm408_vm0, %v4010_v61  ;;  %v3491_v19 = vld [vmem:[%s3950_s22 + $0x26c] sm:$0xf0] }
  0xf1   : > { %3002 = vmatmul.msk.bf16.gmra.mxu2 %vm408_vm0, %v4010_v61 }
  0xf2   : > { %3004 = vmatmul.msk.bf16.gmra.mxu3 %vm408_vm0, %v4010_v61 }
  0xf4   : > { %v4236_v29 = vpop.f32.mrf.mxu2 }
  0xf5   : > { %5195 = vst [vmem:[#allocation19_spill] sm:$0xff] %v4236_v29  ;;  %v4238_v34 = vpop.f32.mrf.mxu3  ;;  %v4240_v35 = vpop.f32.mrf.mxu0  ;;  %v3103_v29 = vld [vmem:[%s3950_s22 + $0x230] sm:$0xf] }
  0xf6   : > { %5196 = vst [vmem:[#allocation20_spill] sm:$0xff] %v4238_v34  ;;  %v4242_v36 = vpop.f32.mrf.mxu1  ;;  %v3104_v18 = vor.u32 %v3491_v19, %v3103_v29  ;;  %v3534_v19 = vld [vmem:[%s3950_s22 + $0x3c4] sm:$0xf0]  ;;  %v3526_v29 = vld [vmem:[%s3950_s22 + $0x38c] sm:$0xf] }
  0xf7   : > { %5197 = vst [vmem:[#allocation21_spill] sm:$0xff] %v4240_v35 }
  0xf8   : > { %5198 = vst [vmem:[#allocation22_spill] sm:$0xff] %v4242_v36 }
  0xfc   : > { %v4248_v47 = vpop.f32.mrf.mxu2 }
  0xfd   : > { %5199 = vst [vmem:[#allocation23_spill] sm:$0xff] %v4248_v47  ;;  %v4250_v49 = vpop.f32.mrf.mxu3  ;;  %v4252_v53 = vpop.f32.mrf.mxu0 }
  0xfe   : > { %5200 = vst [vmem:[#allocation24_spill] sm:$0xff] %v4250_v49  ;;  %v4254_v54 = vpop.f32.mrf.mxu1 }
  0xff   : > { %5201 = vst [vmem:[#allocation25_spill] sm:$0xff] %v4252_v53  ;;  %v3499_v53 = vld [vmem:[%s3950_s22 + $0x2b4] sm:$0xf] }
 0x100   : > { %5202 = vst [vmem:[#allocation26_spill] sm:$0xff] %v4254_v54  ;;  %3005 = vmatmul.msk.bf16.vlgmr.msra.gmra.mxu0 %vm408_vm0, %v3976_v23  ;;  %3007 = vmatmul.msk.bf16.vlgmr.msra.gmra.mxu1 %vm408_vm0, %v3976_v23  ;;  %v3167_v54 = vld [vmem:[%s3950_s22 + $0x2b0] sm:$0xf] }
 0x101   : > { %3009 = vmatmul.msk.bf16.vlgmr.msra.gmra.mxu2 %vm408_vm0, %v3976_v23  ;;  %1479 = vmatpush.bf16.msra.mxu0 %v3120_v13 }
 0x102   : > { %3011 = vmatmul.msk.bf16.vlgmr.msra.gmra.mxu3 %vm408_vm0, %v3976_v23  ;;  %1517 = vmatpush.bf16.msra.mxu2 %v3128_v58  ;;  %v3485_v58 = vld [vmem:[%s3950_s22 + $0x23c] sm:$0xf0] }
 0x103   : > { %1536 = vmatpush.bf16.msra.mxu3 %v3132_v2  ;;  %1498 = vmatpush.bf16.msra.mxu1 %v3124_v15  ;;  %v3056_v2 = vor.u32 %v3485_v58, %v3055_v57  ;;  %v3148_v57 = vor.u32 %v3496_v37, %v3145_v43 }
 0x104   : > { %v4268_v1 = vpop.f32.mrf.mxu2 }
 0x105   : > { %5203 = vst [vmem:[#allocation27_spill] sm:$0xff] %v4268_v1  ;;  %v4270_v3 = vpop.f32.mrf.mxu3  ;;  %v4272_v4 = vpop.f32.mrf.mxu0  ;;  %1480 = vmatpush.bf16.msra.mxu0 %v3056_v2 }
 0x106   : > { %5204 = vst [vmem:[#allocation28_spill] sm:$0xff] %v4270_v3  ;;  %v4274_v6 = vpop.f32.mrf.mxu1  ;;  %1518 = vmatpush.bf16.msra.mxu2 %v3064_v38  ;;  %v3144_v38 = vor.u32 %v3504_v33, %v3143_v27  ;;  %v3137_v27 = vld [vmem:[%s3950_s22 + $0x2d0] sm:$0xf0] }
 0x107   : > { %5205 = vst [vmem:[#allocation29_spill] sm:$0xff] %v4272_v4  ;;  %1537 = vmatpush.bf16.msra.mxu3 %v3068_v45  ;;  %1499 = vmatpush.bf16.msra.mxu1 %v3060_v11  ;;  %v3503_v11 = vld [vmem:[%s3950_s22 + $0x2cc] sm:$0xf0] }
 0x108   : > { %5206 = vst [vmem:[#allocation30_spill] sm:$0xff] %v4274_v6 }
 0x10c   : > { %v4280_v22 = vpop.f32.mrf.mxu2 }
 0x10d   : > { %5207 = vst [vmem:[#allocation31_spill] sm:$0xff] %v4280_v22  ;;  %v4282_v24 = vpop.f32.mrf.mxu3  ;;  %v4284_v25 = vpop.f32.mrf.mxu0 }
 0x10e   : > { %5208 = vst [vmem:[#allocation32_spill] sm:$0xff] %v4282_v24  ;;  %v4286_v26 = vpop.f32.mrf.mxu1  ;;  %v3481_v24 = vld [vmem:[%s3950_s22 + $0x224] sm:$0xf] }
 0x10f   : > { %5209 = vst [vmem:[#allocation33_spill] sm:$0xff] %v4284_v25  ;;  %v3489_v25 = vld [vmem:[%s3950_s22 + $0x25c] sm:$0xf0] }
 0x110   : > { %5210 = vst [vmem:[#allocation34_spill] sm:$0xff] %v4286_v26  ;;  %3006 = vmatmul.msk.bf16.gmra.mxu0 %vm408_vm0, %v4010_v61  ;;  %3008 = vmatmul.msk.bf16.gmra.mxu1 %vm408_vm0, %v4010_v61  ;;  %v3087_v26 = vld [vmem:[%s3950_s22 + $0x220] sm:$0xf] }
 0x111   : > { %3010 = vmatmul.msk.bf16.gmra.mxu2 %vm408_vm0, %v4010_v61  ;;  %v3088_v22 = vor.u32 %v3489_v25, %v3087_v26  ;;  %v3500_v25 = vld [vmem:[%s3950_s22 + $0x2bc] sm:$0xf] }
 0x112   : > { %3012 = vmatmul.msk.bf16.gmra.mxu3 %vm408_vm0, %v4010_v61 }
 0x114   : > { %v4300_v44 = vpop.f32.mrf.mxu2 }
 0x115   : > { %5211 = vst [vmem:[#allocation35_spill] sm:$0xff] %v4300_v44  ;;  %v4302_v46 = vpop.f32.mrf.mxu3  ;;  %v4304_v55 = vpop.f32.mrf.mxu0 }
 0x116   : > { %5212 = vst [vmem:[#allocation36_spill] sm:$0xff] %v4302_v46  ;;  %v4306_v56 = vpop.f32.mrf.mxu1 }
 0x117   : > { %5213 = vst [vmem:[#allocation37_spill] sm:$0xff] %v4304_v55 }
 0x118   : > { %5214 = vst [vmem:[#allocation38_spill] sm:$0xff] %v4306_v56 }
 0x11c   : > { %v4312_v12 = vpop.f32.mrf.mxu2 }
 0x11d   : > { %5215 = vst [vmem:[#allocation39_spill] sm:$0xff] %v4312_v12  ;;  %v4314_v13 = vpop.f32.mrf.mxu3  ;;  %v4316_v14 = vpop.f32.mrf.mxu0 }
 0x11e   : > { %5216 = vst [vmem:[#allocation40_spill] sm:$0xff] %v4314_v13  ;;  %v4318_v15 = vpop.f32.mrf.mxu1  ;;  %v3497_v13 = vld [vmem:[%s3950_s22 + $0x2a4] sm:$0xf] }
 0x11f   : > { %5217 = vst [vmem:[#allocation41_spill] sm:$0xff] %v4316_v14  ;;  %v3136_v14 = vor.u32 %v3503_v11, %v3135_v10  ;;  %v3081_v11 = vld [vmem:[%s3950_s22 + $0x258] sm:$0xf0] }
 0x120   : > { %5218 = vst [vmem:[#allocation42_spill] sm:$0xff] %v4318_v15  ;;  %3013 = vmatmul.msk.bf16.vlgmr.msrb.gmra.mxu0 %vm408_vm0, %v3976_v23  ;;  %3015 = vmatmul.msk.bf16.vlgmr.msrb.gmra.mxu1 %vm408_vm0, %v3976_v23  ;;  %v3495_v15 = vld [vmem:[%s3950_s22 + $0x294] sm:$0xf] }
 0x121   : > { %3017 = vmatmul.msk.bf16.vlgmr.msrb.gmra.mxu2 %vm408_vm0, %v3976_v23  ;;  %v3140_v33 = vor.u32 %v3495_v15, %v3137_v27  ;;  %1555 = vmatpush.bf16.msrb.mxu0 %v3136_v14  ;;  %v3079_v14 = vld [vmem:[%s3950_s22 + $0x218] sm:$0xf] }
 0x122   : > { %3019 = vmatmul.msk.bf16.vlgmr.msrb.gmra.mxu3 %vm408_vm0, %v3976_v23  ;;  %1593 = vmatpush.bf16.msrb.mxu2 %v3144_v38  ;;  %v3488_v15 = vld [vmem:[%s3950_s22 + $0x254] sm:$0xf0] }
 0x123   : > { %1612 = vmatpush.bf16.msrb.mxu3 %v3148_v57  ;;  %1574 = vmatpush.bf16.msrb.mxu1 %v3140_v33  ;;  %v3480_v57 = vld [vmem:[%s3950_s22 + $0x21c] sm:$0xf]  ;;  %v3080_v10 = vor.u32 %v3488_v15, %v3079_v14  ;;  %v3073_v14 = vld [vmem:[%s3950_s22 + $0x250] sm:$0xf0] }
 0x124   : > { %v4332_v45 = vpop.f32.mrf.mxu2  ;;  %v3084_v33 = vor.u32 %v3480_v57, %v3081_v11 }
 0x125   : > { %5219 = vst [vmem:[#allocation43_spill] sm:$0xff] %v4332_v45  ;;  %v4334_v58 = vpop.f32.mrf.mxu3  ;;  %v4336_v0 = vpop.f32.mrf.mxu0 }
 0x126   : > { %5220 = vst [vmem:[#allocation44_spill] sm:$0xff] %v4334_v58  ;;  %v4338_v2 = vpop.f32.mrf.mxu1  ;;  %1594 = vmatpush.bf16.msrb.mxu2 %v3080_v10  ;;  %v3479_v58 = vld [vmem:[%s3950_s22 + $0x214] sm:$0xf] }
 0x127   : > { %5221 = vst [vmem:[#allocation45_spill] sm:$0xff] %v4336_v0  ;;  %1613 = vmatpush.bf16.msrb.mxu3 %v3084_v33  ;;  %v3487_v0 = vld [vmem:[%s3950_s22 + $0x24c] sm:$0xf0]  ;;  %v3076_v15 = vor.u32 %v3479_v58, %v3073_v14  ;;  %v3506_v58 = vld [vmem:[%s3950_s22 + $0x2e4] sm:$0xf0] }
 0x128   : > { %5222 = vst [vmem:[#allocation46_spill] sm:$0xff] %v4338_v2  ;;  %v3161_v33 = vld [vmem:[%s3950_s22 + $0x2e8] sm:$0xf0] }
 0x129   : > { %1575 = vmatpush.bf16.msrb.mxu1 %v3076_v15 }
 0x12c   : > { %v4344_v37 = vpop.f32.mrf.mxu2 }
 0x12d   : > { %5223 = vst [vmem:[#allocation47_spill] sm:$0xff] %v4344_v37  ;;  %v4346_v43 = vpop.f32.mrf.mxu3  ;;  %v4348_v38 = vpop.f32.mrf.mxu0  ;;  %v3071_v37 = vld [vmem:[%s3950_s22 + $0x210] sm:$0xf] }
 0x12e   : > { %5224 = vst [vmem:[#allocation48_spill] sm:$0xff] %v4346_v43  ;;  %v4350_v2 = vpop.f32.mrf.mxu1  ;;  %v3072_v45 = vor.u32 %v3487_v0, %v3071_v37  ;;  %v3498_v0 = vld [vmem:[%s3950_s22 + $0x2ac] sm:$0xf] }
 0x12f   : > { %5225 = vst [vmem:[#allocation49_spill] sm:$0xff] %v4348_v38  ;;  %v3164_v15 = vor.u32 %v3498_v0, %v3161_v33 }
 0x130   : > { %5226 = vst [vmem:[#allocation50_spill] sm:$0xff] %v4350_v2  ;;  %3014 = vmatmul.msk.bf16.gmra.mxu0 %vm408_vm0, %v4010_v61  ;;  %3016 = vmatmul.msk.bf16.gmra.mxu1 %vm408_vm0, %v4010_v61 }
 0x131   : > { %3018 = vmatmul.msk.bf16.gmra.mxu2 %vm408_vm0, %v4010_v61  ;;  %1556 = vmatpush.bf16.msrb.mxu0 %v3072_v45  ;;  %v3159_v45 = vld [vmem:[%s3950_s22 + $0x2a8] sm:$0xf] }
 0x132   : > { %3020 = vmatmul.msk.bf16.gmra.mxu3 %vm408_vm0, %v4010_v61  ;;  %v3160_v37 = vor.u32 %v3506_v58, %v3159_v45  ;;  %v3153_v45 = vld [vmem:[%s3950_s22 + $0x2e0] sm:$0xf0] }
 0x133   : > { %v3156_v58 = vor.u32 %v3497_v13, %v3153_v45  ;;  %v3490_v13 = vld [vmem:[%s3950_s22 + $0x264] sm:$0xf0] }
 0x134   : > { %v4364_v27 = vpop.f32.mrf.mxu2 }
 0x135   : > { %5227 = vst [vmem:[#allocation51_spill] sm:$0xff] %v4364_v27  ;;  %v4366_v2 = vpop.f32.mrf.mxu3  ;;  %v4368_v38 = vpop.f32.mrf.mxu0  ;;  %v3505_v27 = vld [vmem:[%s3950_s22 + $0x2dc] sm:$0xf0] }
 0x136   : > { %5228 = vst [vmem:[#allocation52_spill] sm:$0xff] %v4366_v2  ;;  %v4370_v43 = vpop.f32.mrf.mxu1  ;;  %v3151_v2 = vld [vmem:[%s3950_s22 + $0x2a0] sm:$0xf] }
 0x137   : > { %5229 = vst [vmem:[#allocation53_spill] sm:$0xff] %v4368_v38  ;;  %v3152_v12 = vor.u32 %v3505_v27, %v3151_v2  ;;  %v3482_v2 = vld [vmem:[%s3950_s22 + $0x22c] sm:$0xf] }
 0x138   : > { %5230 = vst [vmem:[#allocation54_spill] sm:$0xff] %v4370_v43 }
 0x13c   : > { %v4376_v57 = vpop.f32.mrf.mxu2 }
 0x13d   : > { %5231 = vst [vmem:[#allocation55_spill] sm:$0xff] %v4376_v57  ;;  %v4378_v11 = vpop.f32.mrf.mxu3  ;;  %v4380_v10 = vpop.f32.mrf.mxu0 }
 0x13e   : > { %5232 = vst [vmem:[#allocation56_spill] sm:$0xff] %v4378_v11  ;;  %v4382_v43 = vpop.f32.mrf.mxu1 }
 0x140   : > { %3181 = vmatmul.msk.bf16.vlgmr.msra.gmra.mxu0 %vm408_vm0, %v3976_v23  ;;  %3183 = vmatmul.msk.bf16.vlgmr.msra.gmra.mxu1 %vm408_vm0, %v3976_v23 }
 0x141   : > { %3185 = vmatmul.msk.bf16.vlgmr.msra.gmra.mxu2 %vm408_vm0, %v3976_v23  ;;  %1631 = vmatpush.bf16.msra.mxu0 %v3152_v12  ;;  %v3095_v12 = vld [vmem:[%s3950_s22 + $0x228] sm:$0xf] }
 0x142   : > { %3187 = vmatmul.msk.bf16.vlgmr.msra.gmra.mxu3 %vm408_vm0, %v3976_v23  ;;  %1669 = vmatpush.bf16.msra.mxu2 %v3160_v37  ;;  %v3096_v27 = vor.u32 %v3490_v13, %v3095_v12  ;;  %v3089_v12 = vld [vmem:[%s3950_s22 + $0x260] sm:$0xf0] }
 0x143   : > { %1688 = vmatpush.bf16.msra.mxu3 %v3164_v15  ;;  %1650 = vmatpush.bf16.msra.mxu1 %v3156_v58  ;;  %v3097_v15 = vld [vmem:[%s3950_s22 + $0x268] sm:$0xf0]  ;;  %v3092_v13 = vor.u32 %v3481_v24, %v3089_v12  ;;  %v3508_v24 = vld [vmem:[%s3950_s22 + $0x2f4] sm:$0xf0] }
 0x144   : > { %v4396_v14 = vpop.f32.mrf.mxu2  ;;  %v3100_v58 = vor.u32 %v3482_v2, %v3097_v15 }
 0x145   : > { %v4398_v11 = vpop.f32.mrf.mxu3  ;;  %v4400_v57 = vpop.f32.mrf.mxu0  ;;  %1632 = vmatpush.bf16.msra.mxu0 %v3088_v22  ;;  %v3175_v22 = vld [vmem:[%s3950_s22 + $0x2b8] sm:$0xf] }
 0x146   : > { %v4402_v38 = vpop.f32.mrf.mxu1  ;;  %1670 = vmatpush.bf16.msra.mxu2 %v3096_v27  ;;  %v3176_v26 = vor.u32 %v3508_v24, %v3175_v22  ;;  %v3169_v22 = vld [vmem:[%s3950_s22 + $0x2f0] sm:$0xf0] }
 0x147   : > { %1689 = vmatpush.bf16.msra.mxu3 %v3100_v58  ;;  %1651 = vmatpush.bf16.msra.mxu1 %v3092_v13  ;;  %v3177_v58 = vld [vmem:[%s3950_s22 + $0x2f8] sm:$0xf0]  ;;  %v3172_v24 = vor.u32 %v3499_v53, %v3169_v22  ;;  %v3492_v53 = vld [vmem:[%s3950_s22 + $0x274] sm:$0xf0] }
 0x148   : > { %v3180_v13 = vor.u32 %v3500_v25, %v3177_v58 }
 0x14c   : > { %v4408_v0 = vpop.f32.mrf.mxu2 }
 0x14d   : > { %v4410_v33 = vpop.f32.mrf.mxu3  ;;  %v4412_v37 = vpop.f32.mrf.mxu0 }
 0x14e   : > { %v4414_v56 = vpop.f32.mrf.mxu1 }
 0x150   : > { %3182 = vmatmul.msk.bf16.gmra.mxu0 %vm408_vm0, %v4010_v61  ;;  %3184 = vmatmul.msk.bf16.gmra.mxu1 %vm408_vm0, %v4010_v61 }
 0x151   : > { %3186 = vmatmul.msk.bf16.gmra.mxu2 %vm408_vm0, %v4010_v61 }
 0x152   : > { %3188 = vmatmul.msk.bf16.gmra.mxu3 %vm408_vm0, %v4010_v61 }
 0x154   : > { %v4428_v45 = vpop.f32.mrf.mxu2 }
 0x155   : > { %v4430_v55 = vpop.f32.mrf.mxu3  ;;  %v4432_v46 = vpop.f32.mrf.mxu0 }
 0x156   : > { %v4434_v44 = vpop.f32.mrf.mxu1 }
 0x15c   : > { %v4440_v2 = vpop.f32.mrf.mxu2 }
 0x15d   : > { %v4442_v15 = vpop.f32.mrf.mxu3  ;;  %v4444_v27 = vpop.f32.mrf.mxu0 }
 0x15e   : > { %v4446_v6 = vpop.f32.mrf.mxu1 }
 0x160   : > { %3189 = vmatmul.msk.bf16.vlgmr.msrb.gmra.mxu0 %vm408_vm0, %v3976_v23  ;;  %3191 = vmatmul.msk.bf16.vlgmr.msrb.gmra.mxu1 %vm408_vm0, %v3976_v23 }
 0x161   : > { %3193 = vmatmul.msk.bf16.vlgmr.msrb.gmra.mxu2 %vm408_vm0, %v3976_v23  ;;  %1726 = vmatpush.bf16.msrb.mxu1 %v3172_v24 }
 0x162   : > { %3195 = vmatmul.msk.bf16.vlgmr.msrb.gmra.mxu3 %vm408_vm0, %v3976_v23  ;;  %1745 = vmatpush.bf16.msrb.mxu2 %v3176_v26  ;;  %v3507_v23 = vld [vmem:[%s3950_s22 + $0x2ec] sm:$0xf0] }
 0x163   : > { %1764 = vmatpush.bf16.msrb.mxu3 %v3180_v13  ;;  %v3168_v49 = vor.u32 %v3507_v23, %v3167_v54  ;;  %v3484_v54 = vld [vmem:[%s3950_s22 + $0x23c] sm:$0xf] }
 0x164   : > { %v4460_v12 = vpop.f32.mrf.mxu2  ;;  %v3113_v23 = vld [vmem:[%s3950_s22 + $0x278] sm:$0xf0] }
 0x165   : > { %v4462_v4 = vpop.f32.mrf.mxu3  ;;  %v4464_v3 = vpop.f32.mrf.mxu0  ;;  %1707 = vmatpush.bf16.msrb.mxu0 %v3168_v49  ;;  %v3111_v49 = vld [vmem:[%s3950_s22 + $0x238] sm:$0xf]  ;;  %v3116_v24 = vor.u32 %v3484_v54, %v3113_v23 }
 0x166   : > { %v4466_v1 = vpop.f32.mrf.mxu1  ;;  %v3112_v13 = vor.u32 %v3492_v53, %v3111_v49  ;;  %v3105_v49 = vld [vmem:[%s3950_s22 + $0x270] sm:$0xf0] }
 0x167   : > { %1765 = vmatpush.bf16.msrb.mxu3 %v3116_v24  ;;  %v4512_v24 = vld [vmem:[#allocation5] sm:$0xff] }
 0x168   : > { %1746 = vmatpush.bf16.msrb.mxu2 %v3112_v13 }
 0x169   : > { %1708 = vmatpush.bf16.msrb.mxu0 %v3104_v18  ;;  %v3319_v18 = vld [vmem:[%s3950_s22 + $0x388] sm:$0xf] }
 0x16c   : > { %v4472_v25 = vpop.f32.mrf.mxu2 }
 0x16d   : > { %v4474_v58 = vpop.f32.mrf.mxu3  ;;  %v4476_v26 = vpop.f32.mrf.mxu0 }
 0x16e   : > { %5233 = vst [vmem:[#allocation57_spill] sm:$0xff] %v4474_v58  ;;  %v4478_v47 = vpop.f32.mrf.mxu1 }
 0x16f   : > { %5234 = vst [vmem:[#allocation58_spill] sm:$0xff] %v4476_v26 }
 0x170   : > { %5235 = vst [vmem:[#allocation59_spill] sm:$0xff] %v4478_v47  ;;  %3190 = vmatmul.msk.bf16.gmra.mxu0 %vm408_vm0, %v4010_v61  ;;  %3192 = vmatmul.msk.bf16.gmra.mxu1 %vm408_vm0, %v4010_v61  ;;  %v3483_v47 = vld [vmem:[%s3950_s22 + $0x234] sm:$0xf] }
 0x171   : > { %3194 = vmatmul.msk.bf16.gmra.mxu2 %vm408_vm0, %v4010_v61  ;;  %v3108_v53 = vor.u32 %v3483_v47, %v3105_v49  ;;  %v3320_v47 = vor.u32 %v3534_v19, %v3319_v18  ;;  %v3321_v49 = vld [vmem:[%s3950_s22 + $0x3c8] sm:$0xf0]  ;;  %v3313_v18 = vld [vmem:[%s3950_s22 + $0x3c0] sm:$0xf0] }
 0x172   : > { %3196 = vmatmul.msk.bf16.gmra.mxu3 %vm408_vm0, %v4010_v61 }
 0x173   : > { %1727 = vmatpush.bf16.msrb.mxu1 %v3108_v53 }
 0x174   : > { %v4492_v22 = vpop.f32.mrf.mxu2 }
 0x175   : > { %5236 = vst [vmem:[#allocation60_spill] sm:$0xff] %v4492_v22  ;;  %v4494_v36 = vpop.f32.mrf.mxu3  ;;  %v4496_v35 = vpop.f32.mrf.mxu0  ;;  %v3525_v22 = vld [vmem:[%s3950_s22 + $0x384] sm:$0xf] }
 0x176   : > { %5237 = vst [vmem:[#allocation61_spill] sm:$0xff] %v4494_v36  ;;  %v4498_v34 = vpop.f32.mrf.mxu1  ;;  %v3533_v36 = vld [vmem:[%s3950_s22 + $0x3bc] sm:$0xf0]  ;;  %v3316_v19 = vor.u32 %v3525_v22, %v3313_v18  ;;  %v3257_v22 = vld [vmem:[%s3950_s22 + $0x348] sm:$0xf0] }
 0x177   : > { %5238 = vst [vmem:[#allocation62_spill] sm:$0xff] %v4496_v35  ;;  %v3311_v35 = vld [vmem:[%s3950_s22 + $0x380] sm:$0xf] }
 0x178   : > { %5239 = vst [vmem:[#allocation63_spill] sm:$0xff] %v4498_v34  ;;  %v3312_v26 = vor.u32 %v3533_v36, %v3311_v35  ;;  %v3518_v35 = vld [vmem:[%s3950_s22 + $0x344] sm:$0xf0]  ;;  %v3510_v36 = vld [vmem:[%s3950_s22 + $0x30c] sm:$0xf] }
 0x17c   : > { %v4504_v54 = vpop.f32.mrf.mxu2 }
 0x17d   : > { %5240 = vst [vmem:[#allocation64_spill] sm:$0xff] %v4504_v54  ;;  %v4506_v23 = vpop.f32.mrf.mxu3  ;;  %v4508_v13 = vpop.f32.mrf.mxu0 }
 0x17e   : > { %5241 = vst [vmem:[#allocation65_spill] sm:$0xff] %v4506_v23  ;;  %v4510_v34 = vpop.f32.mrf.mxu1 }
 0x17f   : > { %5242 = vst [vmem:[#allocation66_spill] sm:$0xff] %v4508_v13 }
 0x180   : > { %5243 = vst [vmem:[#allocation67_spill] sm:$0xff] %v4510_v34  ;;  %3197 = vmatmul.msk.bf16.vlgmr.msra.gmra.mxu0 %vm408_vm0, %v4512_v24  ;;  %3199 = vmatmul.msk.bf16.vlgmr.msra.gmra.mxu1 %vm408_vm0, %v4512_v24  ;;  %v3324_v34 = vor.u32 %v3526_v29, %v3321_v49 }
 0x181   : > { %3201 = vmatmul.msk.bf16.vlgmr.msra.gmra.mxu2 %vm408_vm0, %v4512_v24  ;;  %2040 = vmatpush.bf16.msra.mxu0 %v3312_v26 }
 0x182   : > { %3203 = vmatmul.msk.bf16.vlgmr.msra.gmra.mxu3 %vm408_vm0, %v4512_v24  ;;  %2078 = vmatpush.bf16.msra.mxu2 %v3320_v47 }
 0x183   : > { %2097 = vmatpush.bf16.msra.mxu3 %v3324_v34  ;;  %2059 = vmatpush.bf16.msra.mxu1 %v3316_v19  ;;  %v3255_v34 = vld [vmem:[%s3950_s22 + $0x308] sm:$0xf]  ;;  %v3260_v19 = vor.u32 %v3510_v36, %v3257_v22 }
 0x184   : > { %v4526_v53 = vpop.f32.mrf.mxu2  ;;  %v3256_v26 = vor.u32 %v3518_v35, %v3255_v34  ;;  %v3249_v34 = vld [vmem:[%s3950_s22 + $0x340] sm:$0xf0] }
 0x185   : > { %5244 = vst [vmem:[#allocation68_spill] sm:$0xff] %v4526_v53  ;;  %v4528_v13 = vpop.f32.mrf.mxu3  ;;  %v4530_v23 = vpop.f32.mrf.mxu0 }
 0x186   : > { %5245 = vst [vmem:[#allocation69_spill] sm:$0xff] %v4528_v13  ;;  %v4532_v54 = vpop.f32.mrf.mxu1  ;;  %2079 = vmatpush.bf16.msra.mxu2 %v3256_v26 }
 0x187   : > { %5246 = vst [vmem:[#allocation70_spill] sm:$0xff] %v4530_v23  ;;  %2098 = vmatpush.bf16.msra.mxu3 %v3260_v19  ;;  %v3509_v23 = vld [vmem:[%s3950_s22 + $0x304] sm:$0xf] }
 0x188   : > { %5247 = vst [vmem:[#allocation71_spill] sm:$0xff] %v4532_v54  ;;  %v3252_v35 = vor.u32 %v3509_v23, %v3249_v34  ;;  %v3335_v23 = vld [vmem:[%s3950_s22 + $0x398] sm:$0xf] }
 0x18a   : > { %2060 = vmatpush.bf16.msra.mxu1 %v3252_v35 }
 0x18c   : > { %v4538_v29 = vpop.f32.mrf.mxu2 }
 0x18d   : > { %5248 = vst [vmem:[#allocation72_spill] sm:$0xff] %v4538_v29  ;;  %v4540_v49 = vpop.f32.mrf.mxu3  ;;  %v4542_v47 = vpop.f32.mrf.mxu0  ;;  %v3247_v29 = vld [vmem:[%s3950_s22 + $0x300] sm:$0xf] }
 0x18e   : > { %5249 = vst [vmem:[#allocation73_spill] sm:$0xff] %v4540_v49  ;;  %v4544_v54 = vpop.f32.mrf.mxu1 }
 0x18f   : > { %5250 = vst [vmem:[#allocation74_spill] sm:$0xff] %v4542_v47 }
 0x190   : > { %5251 = vst [vmem:[#allocation75_spill] sm:$0xff] %v4544_v54  ;;  %3198 = vmatmul.msk.bf16.gmra.mxu0 %vm408_vm0, %v4010_v61  ;;  %3200 = vmatmul.msk.bf16.gmra.mxu1 %vm408_vm0, %v4010_v61 }
 0x191   : > { %3202 = vmatmul.msk.bf16.gmra.mxu2 %vm408_vm0, %v4010_v61 }
 0x192   : > { %3204 = vmatmul.msk.bf16.gmra.mxu3 %vm408_vm0, %v4010_v61  ;;  %v3517_v61 = vld [vmem:[%s3950_s22 + $0x33c] sm:$0xf0] }
 0x193   : > { %v3248_v13 = vor.u32 %v3517_v61, %v3247_v29  ;;  %v3528_v29 = vld [vmem:[%s3950_s22 + $0x39c] sm:$0xf] }
 0x194   : > { %v4558_v18 = vpop.f32.mrf.mxu2  ;;  %v3337_v61 = vld [vmem:[%s3950_s22 + $0x3d8] sm:$0xf0] }
 0x195   : > { %5252 = vst [vmem:[#allocation76_spill] sm:$0xff] %v4558_v18  ;;  %v4560_v54 = vpop.f32.mrf.mxu3  ;;  %v4562_v47 = vpop.f32.mrf.mxu0  ;;  %2041 = vmatpush.bf16.msra.mxu0 %v3248_v13  ;;  %v3536_v13 = vld [vmem:[%s3950_s22 + $0x3d4] sm:$0xf0]  ;;  %v3340_v35 = vor.u32 %v3528_v29, %v3337_v61 }
 0x196   : > { %5253 = vst [vmem:[#allocation77_spill] sm:$0xff] %v4560_v54  ;;  %v4564_v49 = vpop.f32.mrf.mxu1  ;;  %v3336_v19 = vor.u32 %v3536_v13, %v3335_v23  ;;  %v3527_v54 = vld [vmem:[%s3950_s22 + $0x394] sm:$0xf] }
 0x197   : > { %5254 = vst [vmem:[#allocation78_spill] sm:$0xff] %v4562_v47  ;;  %v3535_v47 = vld [vmem:[%s3950_s22 + $0x3cc] sm:$0xf0]  ;;  %v3329_v23 = vld [vmem:[%s3950_s22 + $0x3d0] sm:$0xf0] }
 0x198   : > { %5255 = vst [vmem:[#allocation79_spill] sm:$0xff] %v4564_v49  ;;  %v3332_v13 = vor.u32 %v3527_v54, %v3329_v23  ;;  %v3271_v54 = vld [vmem:[%s3950_s22 + $0x318] sm:$0xf]  ;;  %v3273_v23 = vld [vmem:[%s3950_s22 + $0x358] sm:$0xf0] }
 0x19c   : > { %v4570_v36 = vpop.f32.mrf.mxu2 }
 0x19d   : > { %5256 = vst [vmem:[#allocation80_spill] sm:$0xff] %v4570_v36  ;;  %v4572_v22 = vpop.f32.mrf.mxu3  ;;  %v4574_v26 = vpop.f32.mrf.mxu0  ;;  %v3327_v36 = vld [vmem:[%s3950_s22 + $0x390] sm:$0xf] }
 0x19e   : > { %5257 = vst [vmem:[#allocation81_spill] sm:$0xff] %v4572_v22  ;;  %v4576_v49 = vpop.f32.mrf.mxu1  ;;  %v3328_v18 = vor.u32 %v3535_v47, %v3327_v36  ;;  %v3520_v47 = vld [vmem:[%s3950_s22 + $0x354] sm:$0xf0] }
 0x19f   : > { %5258 = vst [vmem:[#allocation82_spill] sm:$0xff] %v4574_v26  ;;  %v3272_v36 = vor.u32 %v3520_v47, %v3271_v54  ;;  %v1216_v54 = vmax.f32 %v4124_v20, %v4380_v10  ;;  %v3351_v20 = vld [vmem:[%s3950_s22 + $0x3a8] sm:$0xf]  ;;  %v1218_v10 = vmax.f32 %v4140_v28, %v4396_v14 }
 0x1a0   : > { %5259 = vst [vmem:[#allocation83_spill] sm:$0xff] %v4576_v49  ;;  %3205 = vmatmul.msk.bf16.vlgmr.msrb.gmra.mxu0 %vm408_vm0, %v4512_v24  ;;  %3207 = vmatmul.msk.bf16.vlgmr.msrb.gmra.mxu1 %vm408_vm0, %v4512_v24 }
 0x1a1   : > { %3209 = vmatmul.msk.bf16.vlgmr.msrb.gmra.mxu2 %vm408_vm0, %v4512_v24  ;;  %2116 = vmatpush.bf16.msrb.mxu0 %v3328_v18  ;;  %v3512_v18 = vld [vmem:[%s3950_s22 + $0x31c] sm:$0xf] }
 0x1a2   : > { %3211 = vmatmul.msk.bf16.vlgmr.msrb.gmra.mxu3 %vm408_vm0, %v4512_v24  ;;  %2154 = vmatpush.bf16.msrb.mxu2 %v3336_v19 }
 0x1a3   : > { %2173 = vmatpush.bf16.msrb.mxu3 %v3340_v35  ;;  %2135 = vmatpush.bf16.msrb.mxu1 %v3332_v13  ;;  %v4610_v35 = vld [vmem:[#allocation5 + $0x8] sm:$0xff] }
 0x1a4   : > { %v4590_v34 = vpop.f32.mrf.mxu2 }
 0x1a5   : > { %5260 = vst [vmem:[#allocation84_spill] sm:$0xff] %v4590_v34  ;;  %v4592_v49 = vpop.f32.mrf.mxu3  ;;  %v4594_v26 = vpop.f32.mrf.mxu0  ;;  %v3511_v34 = vld [vmem:[%s3950_s22 + $0x314] sm:$0xf] }
 0x1a6   : > { %5261 = vst [vmem:[#allocation85_spill] sm:$0xff] %v4592_v49  ;;  %v4596_v22 = vpop.f32.mrf.mxu1  ;;  %2155 = vmatpush.bf16.msrb.mxu2 %v3272_v36  ;;  %v3519_v49 = vld [vmem:[%s3950_s22 + $0x34c] sm:$0xf0]  ;;  %v3268_v58 = vor.u32 %v3511_v34, %v3265_v17  ;;  %v1219_v34 = vmax.f32 %v4142_v30, %v4398_v11 }
 0x1a7   : > { %5262 = vst [vmem:[#allocation86_spill] sm:$0xff] %v4594_v26  ;;  %v3263_v26 = vld [vmem:[%s3950_s22 + $0x310] sm:$0xf] }
 0x1a8   : > { %5263 = vst [vmem:[#allocation87_spill] sm:$0xff] %v4596_v22  ;;  %v3264_v53 = vor.u32 %v3519_v49, %v3263_v26  ;;  %2136 = vmatpush.bf16.msrb.mxu1 %v3268_v58 }
 0x1aa   : > { %2117 = vmatpush.bf16.msrb.mxu0 %v3264_v53  ;;  %v3353_v53 = vld [vmem:[%s3950_s22 + $0x3e8] sm:$0xf0] }
 0x1ac   : > { %v4602_v29 = vpop.f32.mrf.mxu2 }
 0x1ad   : > { %5264 = vst [vmem:[#allocation88_spill] sm:$0xff] %v4602_v29  ;;  %v4604_v61 = vpop.f32.mrf.mxu3  ;;  %v4606_v19 = vpop.f32.mrf.mxu0 }
 0x1ae   : > { %5265 = vst [vmem:[#allocation89_spill] sm:$0xff] %v4604_v61  ;;  %v4608_v22 = vpop.f32.mrf.mxu1 }
 0x1af   : > { %5266 = vst [vmem:[#allocation90_spill] sm:$0xff] %v4606_v19 }
 0x1b0   : > { %5267 = vst [vmem:[#allocation91_spill] sm:$0xff] %v4608_v22  ;;  %3206 = vmatmul.msk.bf16.gmra.mxu0 %vm408_vm0, %v4610_v35  ;;  %3208 = vmatmul.msk.bf16.gmra.mxu1 %vm408_vm0, %v4610_v35  ;;  %v3276_v22 = vor.u32 %v3512_v18, %v3273_v23  ;;  %v1232_v23 = vmax.f32 %v4144_v31, %v4400_v57  ;;  %v3343_v31 = vld [vmem:[%s3950_s22 + $0x3a0] sm:$0xf] }
 0x1b1   : > { %3210 = vmatmul.msk.bf16.gmra.mxu2 %vm408_vm0, %v4610_v35  ;;  %v3537_v57 = vld [vmem:[%s3950_s22 + $0x3dc] sm:$0xf0] }
 0x1b2   : > { %3212 = vmatmul.msk.bf16.gmra.mxu3 %vm408_vm0, %v4610_v35 }
 0x1b3   : > { %2174 = vmatpush.bf16.msrb.mxu3 %v3276_v22  ;;  %v1217_v22 = vmax.f32 %v4126_v21, %v4382_v43  ;;  %v3538_v21 = vld [vmem:[%s3950_s22 + $0x3e4] sm:$0xf0]  ;;  %v3530_v43 = vld [vmem:[%s3950_s22 + $0x3ac] sm:$0xf] }
 0x1b4   : > { %v4624_v13 = vpop.f32.mrf.mxu2  ;;  %v3352_v58 = vor.u32 %v3538_v21, %v3351_v20 }
 0x1b5   : > { %v4626_v19 = vpop.f32.mrf.mxu3  ;;  %v4628_v61 = vpop.f32.mrf.mxu0 }
 0x1b6   : > { %v4630_v29 = vpop.f32.mrf.mxu1 }
 0x1bc   : > { %v4638_v47 = vpop.f32.mrf.mxu2 }
 0x1bd   : > { %v4642_v18 = vpop.f32.mrf.mxu3  ;;  %v1482_v36 = vpop.f32.mrf.mxu0 }
 0x1be   : > { %v4644_v49 = vmax.f32 %v1216_v54, %v1482_v36  ;;  %v1501_v26 = vpop.f32.mrf.mxu1  ;;  %v1233_v36 = vmax.f32 %v4146_v32, %v4402_v38  ;;  %v1234_v32 = vmax.f32 %v4152_v39, %v4408_v0  ;;  %v1235_v38 = vmax.f32 %v4154_v40, %v4410_v33 }
 0x1bf   : > { %v4646_v17 = vmax.f32 %v1217_v22, %v1501_v26  ;;  %v3356_v22 = vor.u32 %v3530_v43, %v3353_v53  ;;  %v3344_v43 = vor.u32 %v3537_v57, %v3343_v31  ;;  %v3345_v53 = vld [vmem:[%s3950_s22 + $0x3e0] sm:$0xf0]  ;;  %v1250_v33 = vmax.f32 %v4172_v48, %v4428_v45 }
 0x1c0   : > { %5268 = vst [vmem:[#allocation92_spill] sm:$0xff] %v4644_v49  ;;  %3373 = vmatmul.msk.bf16.vlgmr.msra.gmra.mxu0 %vm408_vm0, %v4512_v24  ;;  %3375 = vmatmul.msk.bf16.vlgmr.msra.gmra.mxu1 %vm408_vm0, %v4512_v24  ;;  %v1265_v31 = vmax.f32 %v4178_v52, %v4434_v44  ;;  %v1266_v52 = vmax.f32 %v4184_v59, %v4440_v2 }
 0x1c1   : > { %5269 = vst [vmem:[#allocation93_spill] sm:$0xff] %v4646_v17  ;;  %3377 = vmatmul.msk.bf16.vlgmr.msra.gmra.mxu2 %vm408_vm0, %v4512_v24  ;;  %v3529_v17 = vld [vmem:[%s3950_s22 + $0x3a4] sm:$0xf]  ;;  %2192 = vmatpush.bf16.msra.mxu0 %v3344_v43  ;;  %v1267_v44 = vmax.f32 %v4186_v60, %v4442_v15  ;;  %v1222_v15 = vmax.f32 %v4204_v5, %v4460_v12 }
 0x1c2   : > { %3379 = vmatmul.msk.bf16.vlgmr.msra.gmra.mxu3 %vm408_vm0, %v4512_v24  ;;  %2230 = vmatpush.bf16.msra.mxu2 %v3352_v58  ;;  %v3348_v49 = vor.u32 %v3529_v17, %v3345_v53 }
 0x1c3   : > { %2249 = vmatpush.bf16.msra.mxu3 %v3356_v22  ;;  %v3289_v22 = vld [vmem:[%s3950_s22 + $0x368] sm:$0xf0] }
 0x1c4   : > { %v1520_v54 = vpop.f32.mrf.mxu2  ;;  %2211 = vmatpush.bf16.msra.mxu1 %v3348_v49 }
 0x1c5   : > { %v4668_v26 = vmax.f32 %v1218_v10, %v1520_v54  ;;  %v1539_v28 = vpop.f32.mrf.mxu3  ;;  %v1484_v14 = vpop.f32.mrf.mxu0  ;;  %v1248_v10 = vmax.f32 %v4156_v41, %v4412_v37  ;;  %v3287_v41 = vld [vmem:[%s3950_s22 + $0x328] sm:$0xf] }
 0x1c6   : > { %v4670_v20 = vmax.f32 %v1219_v34, %v1539_v28  ;;  %v4672_v21 = vmax.f32 %v1232_v23, %v1484_v14  ;;  %v1503_v30 = vpop.f32.mrf.mxu1  ;;  %v1249_v34 = vmax.f32 %v4158_v42, %v4414_v56  ;;  %v3522_v42 = vld [vmem:[%s3950_s22 + $0x364] sm:$0xf0]  ;;  %v3514_v56 = vld [vmem:[%s3950_s22 + $0x32c] sm:$0xf]  ;;  %v1264_v28 = vmax.f32 %v4176_v51, %v4432_v46  ;;  %v3279_v51 = vld [vmem:[%s3950_s22 + $0x320] sm:$0xf] }
 0x1c7   : > { %v4674_v11 = vmax.f32 %v1233_v36, %v1503_v30  ;;  %v3288_v37 = vor.u32 %v3522_v42, %v3287_v41  ;;  %v1251_v36 = vmax.f32 %v4174_v50, %v4430_v55  ;;  %v3292_v30 = vor.u32 %v3514_v56, %v3289_v22  ;;  %v3521_v46 = vld [vmem:[%s3950_s22 + $0x35c] sm:$0xf0] }
 0x1c8   : > { %v1236_v22 = vmax.f32 %v4208_v8, %v4464_v3  ;;  %v3359_v8 = vld [vmem:[%s3950_s22 + $0x3b0] sm:$0xf] }
 0x1c9   : > { %2231 = vmatpush.bf16.msra.mxu2 %v3288_v37  ;;  %2250 = vmatpush.bf16.msra.mxu3 %v3292_v30  ;;  %v1223_v37 = vmax.f32 %v4206_v7, %v4462_v4  ;;  %v3539_v3 = vld [vmem:[%s3950_s22 + $0x3ec] sm:$0xf0] }
 0x1cc   : > { %v1522_v58 = vpop.f32.mrf.mxu2 }
 0x1cd   : > { %v4688_v23 = vmax.f32 %v1234_v32, %v1522_v58  ;;  %v1541_v17 = vpop.f32.mrf.mxu3  ;;  %v1487_v54 = vpop.f32.mrf.mxu0  ;;  %v3513_v32 = vld [vmem:[%s3950_s22 + $0x324] sm:$0xf] }
 0x1ce   : > { %v4690_v39 = vmax.f32 %v1235_v38, %v1541_v17  ;;  %v4692_v0 = vmax.f32 %v1248_v10, %v1487_v54  ;;  %v1506_v49 = vpop.f32.mrf.mxu1  ;;  %v3280_v38 = vor.u32 %v3521_v46, %v3279_v51  ;;  %v3281_v10 = vld [vmem:[%s3950_s22 + $0x360] sm:$0xf0]  ;;  %v1221_v54 = vmax.f32 %v4190_v63, %v4446_v6  ;;  %v3540_v63 = vld [vmem:[%s3950_s22 + $0x3f4] sm:$0xf0]  ;;  %v3532_v6 = vld [vmem:[%s3950_s22 + $0x3bc] sm:$0xf] }
 0x1cf   : > { %v4694_v40 = vmax.f32 %v1249_v34, %v1506_v49  ;;  %v3284_v58 = vor.u32 %v3513_v32, %v3281_v10  ;;  %v1220_v34 = vmax.f32 %v4188_v62, %v4444_v27  ;;  %v3367_v62 = vld [vmem:[%s3950_s22 + $0x3b8] sm:$0xf]  ;;  %v3361_v51 = vld [vmem:[%s3950_s22 + $0x3f0] sm:$0xf0]  ;;  %v5272_v10 = vld [vmem:[#allocation58_spill] sm:$0xff] }
 0x1d0   : > { %3374 = vmatmul.msk.bf16.gmra.mxu0 %vm408_vm0, %v4610_v35  ;;  %3376 = vmatmul.msk.bf16.gmra.mxu1 %vm408_vm0, %v4610_v35  ;;  %v3368_v27 = vor.u32 %v3540_v63, %v3367_v62  ;;  %v5271_v32 = vld [vmem:[#allocation16_spill] sm:$0xff] }
 0x1d1   : > { %3378 = vmatmul.msk.bf16.gmra.mxu2 %vm408_vm0, %v4610_v35  ;;  %2193 = vmatpush.bf16.msra.mxu0 %v3280_v38 }
 0x1d2   : > { %3380 = vmatmul.msk.bf16.gmra.mxu3 %vm408_vm0, %v4610_v35  ;;  %2212 = vmatpush.bf16.msra.mxu1 %v3284_v58  ;;  %v5273_v58 = vld [vmem:[#allocation17_spill] sm:$0xff] }
 0x1d4   : > { %v1525_v14 = vpop.f32.mrf.mxu2 }
 0x1d5   : > { %v4716_v57 = vmax.f32 %v1250_v33, %v1525_v14  ;;  %v1544_v48 = vpop.f32.mrf.mxu3  ;;  %v1489_v45 = vpop.f32.mrf.mxu0  ;;  %v3369_v33 = vld [vmem:[%s3950_s22 + $0x3f8] sm:$0xf0]  ;;  %v1237_v14 = vmax.f32 %v4210_v9, %v4466_v1  ;;  %v1238_v9 = vmax.f32 %v4216_v16, %v4472_v25 }
 0x1d6   : > { %v4718_v43 = vmax.f32 %v1251_v36, %v1544_v48  ;;  %v4720_v53 = vmax.f32 %v1264_v28, %v1489_v45  ;;  %v1508_v50 = vpop.f32.mrf.mxu1  ;;  %v3372_v28 = vor.u32 %v3532_v6, %v3369_v33  ;;  %v3531_v45 = vld [vmem:[%s3950_s22 + $0x3b4] sm:$0xf]  ;;  %v5270_v1 = vld [vmem:[#allocation57_spill] sm:$0xff] }
 0x1d7   : > { %v4722_v55 = vmax.f32 %v1265_v31, %v1508_v50  ;;  %v3360_v50 = vor.u32 %v3539_v3, %v3359_v8  ;;  %v3364_v46 = vor.u32 %v3531_v45, %v3361_v51  ;;  %v1239_v38 = vmax.f32 %v5271_v32, %v5270_v1  ;;  %v3303_v6 = vld [vmem:[%s3950_s22 + $0x338] sm:$0xf]  ;;  %v5276_v33 = vld [vmem:[#allocation60_spill] sm:$0xff]  ;;  %v5282_v51 = vld [vmem:[#allocation63_spill] sm:$0xff] }
 0x1d8   : > { %v5281_v8 = vld [vmem:[#allocation21_spill] sm:$0xff] }
 0x1dc   : > { %v1527_v17 = vpop.f32.mrf.mxu2 }
 0x1dd   : > { %v4736_v49 = vmax.f32 %v1266_v52, %v1527_v17  ;;  %v1546_v41 = vpop.f32.mrf.mxu3  ;;  %v1558_v42 = vpop.f32.mrf.mxu0  ;;  %v1252_v52 = vmax.f32 %v5273_v58, %v5272_v10  ;;  %v5275_v17 = vld [vmem:[#allocation18_spill] sm:$0xff] }
 0x1de   : > { %v4738_v59 = vmax.f32 %v1267_v44, %v1546_v41  ;;  %v4740_v2 = vmax.f32 %v1220_v34, %v1558_v42  ;;  %v1577_v56 = vpop.f32.mrf.mxu1  ;;  %v5274_v34 = vld [vmem:[#allocation59_spill] sm:$0xff] }
 0x1df   : > { %v4742_v60 = vmax.f32 %v1221_v54, %v1577_v56  ;;  %v1253_v54 = vmax.f32 %v5275_v17, %v5274_v34  ;;  %v3295_v34 = vld [vmem:[%s3950_s22 + $0x330] sm:$0xf] }
 0x1e0   : > { %3381 = vmatmul.msk.bf16.vlgmr.msrb.gmra.mxu0 %vm408_vm0, %v4512_v24  ;;  %3383 = vmatmul.msk.bf16.vlgmr.msrb.gmra.mxu1 %vm408_vm0, %v4512_v24  ;;  %v3523_v17 = vld [vmem:[%s3950_s22 + $0x36c] sm:$0xf0] }
 0x1e1   : > { %3385 = vmatmul.msk.bf16.vlgmr.msrb.gmra.mxu2 %vm408_vm0, %v4512_v24  ;;  %2268 = vmatpush.bf16.msrb.mxu0 %v3360_v50 }
 0x1e2   : > { %3387 = vmatmul.msk.bf16.vlgmr.msrb.gmra.mxu3 %vm408_vm0, %v4512_v24  ;;  %2306 = vmatpush.bf16.msrb.mxu2 %v3368_v27  ;;  %v3516_v27 = vld [vmem:[%s3950_s22 + $0x33c] sm:$0xf] }
 0x1e3   : > { %2325 = vmatpush.bf16.msrb.mxu3 %v3372_v28  ;;  %2287 = vmatpush.bf16.msrb.mxu1 %v3364_v46  ;;  %v3305_v28 = vld [vmem:[%s3950_s22 + $0x378] sm:$0xf0]  ;;  %v5283_v46 = vld [vmem:[#allocation22_spill] sm:$0xff] }
 0x1e4   : > { %v1596_v36 = vpop.f32.mrf.mxu2  ;;  %v3308_v50 = vor.u32 %v3516_v27, %v3305_v28  ;;  %v5289_v28 = vld [vmem:[#allocation25_spill] sm:$0xff] }
 0x1e5   : > { %v4764_v30 = vmax.f32 %v1222_v15, %v1596_v36  ;;  %v1615_v5 = vpop.f32.mrf.mxu3  ;;  %v1560_v12 = vpop.f32.mrf.mxu0  ;;  %v3524_v15 = vld [vmem:[%s3950_s22 + $0x374] sm:$0xf0] }
 0x1e6   : > { %v4766_v31 = vmax.f32 %v1223_v37, %v1615_v5  ;;  %v4768_v48 = vmax.f32 %v1236_v22, %v1560_v12  ;;  %v1579_v7 = vpop.f32.mrf.mxu1  ;;  %v5277_v37 = vld [vmem:[#allocation19_spill] sm:$0xff]  ;;  %v3304_v36 = vor.u32 %v3524_v15, %v3303_v6  ;;  %v5279_v5 = vld [vmem:[#allocation20_spill] sm:$0xff] }
 0x1e7   : > { %v4770_v4 = vmax.f32 %v1237_v14, %v1579_v7  ;;  %v1254_v22 = vmax.f32 %v5277_v37, %v5276_v33  ;;  %v5278_v14 = vld [vmem:[#allocation61_spill] sm:$0xff]  ;;  %v5280_v7 = vld [vmem:[#allocation62_spill] sm:$0xff]  ;;  %2326 = vmatpush.bf16.msrb.mxu3 %v3308_v50  ;;  %v5284_v6 = vld [vmem:[#allocation64_spill] sm:$0xff] }
 0x1e8   : > { %v1255_v12 = vmax.f32 %v5279_v5, %v5278_v14  ;;  %v1268_v3 = vmax.f32 %v5281_v8, %v5280_v7  ;;  %2307 = vmatpush.bf16.msrb.mxu2 %v3304_v36  ;;  %v5285_v15 = vld [vmem:[#allocation23_spill] sm:$0xff]  ;;  %v5286_v33 = vld [vmem:[#allocation65_spill] sm:$0xff]  ;;  %v5287_v37 = vld [vmem:[#allocation24_spill] sm:$0xff] }
 0x1e9   : > { %v1270_v27 = vmax.f32 %v5285_v15, %v5284_v6  ;;  %v5288_v36 = vld [vmem:[#allocation66_spill] sm:$0xff] }
 0x1ea   : > { %v1224_v14 = vmax.f32 %v5289_v28, %v5288_v36  ;;  %v5291_v7 = vld [vmem:[#allocation26_spill] sm:$0xff] }
 0x1ec   : > { %v1598_v44 = vpop.f32.mrf.mxu2 }
 0x1ed   : > { %v4784_v41 = vmax.f32 %v1238_v9, %v1598_v44  ;;  %v1617_v42 = vpop.f32.mrf.mxu3  ;;  %v1563_v56 = vpop.f32.mrf.mxu0  ;;  %v1269_v9 = vmax.f32 %v5283_v46, %v5282_v51 }
 0x1ee   : > { %v4786_v16 = vmax.f32 %v1239_v38, %v1617_v42  ;;  %v4788_v25 = vmax.f32 %v1252_v52, %v1563_v56  ;;  %v1582_v62 = vpop.f32.mrf.mxu1  ;;  %v3296_v42 = vor.u32 %v3523_v17, %v3295_v34  ;;  %v3297_v56 = vld [vmem:[%s3950_s22 + $0x370] sm:$0xf0]  ;;  %v5294_v17 = vld [vmem:[#allocation69_spill] sm:$0xff] }
 0x1ef   : > { %v4790_v63 = vmax.f32 %v1253_v54, %v1582_v62  ;;  %v3515_v54 = vld [vmem:[%s3950_s22 + $0x334] sm:$0xf] }
 0x1f0   : > { %3382 = vmatmul.msk.bf16.gmra.mxu0 %vm408_vm0, %v4610_v35  ;;  %3384 = vmatmul.msk.bf16.gmra.mxu1 %vm408_vm0, %v4610_v35  ;;  %v3300_v62 = vor.u32 %v3515_v54, %v3297_v56  ;;  %v5295_v54 = vld [vmem:[#allocation28_spill] sm:$0xff]  ;;  %v5296_v56 = vld [vmem:[#allocation70_spill] sm:$0xff] }
 0x1f1   : > { %3386 = vmatmul.msk.bf16.gmra.mxu2 %vm408_vm0, %v4610_v35  ;;  %2269 = vmatpush.bf16.msrb.mxu0 %v3296_v42  ;;  %v1227_v42 = vmax.f32 %v5295_v54, %v5294_v17  ;;  %v5306_v17 = vld [vmem:[#allocation74_spill] sm:$0xff]  ;;  %v5307_v54 = vld [vmem:[#allocation33_spill] sm:$0xff] }
 0x1f2   : > { %3388 = vmatmul.msk.bf16.gmra.mxu3 %vm408_vm0, %v4610_v35  ;;  %2288 = vmatpush.bf16.msrb.mxu1 %v3300_v62  ;;  %v5297_v62 = vld [vmem:[#allocation29_spill] sm:$0xff] }
 0x1f3   : > { %v1240_v6 = vmax.f32 %v5297_v62, %v5296_v56  ;;  %v1256_v56 = vmax.f32 %v5307_v54, %v5306_v17  ;;  %v5308_v62 = vld [vmem:[#allocation75_spill] sm:$0xff]  ;;  %v5318_v17 = vld [vmem:[#allocation78_spill] sm:$0xff]  ;;  %v5319_v54 = vld [vmem:[#allocation37_spill] sm:$0xff] }
 0x1f4   : > { %v1601_v45 = vpop.f32.mrf.mxu2 }
 0x1f5   : > { %v4812_v1 = vmax.f32 %v1254_v22, %v1601_v45  ;;  %v1620_v32 = vpop.f32.mrf.mxu3  ;;  %v1565_v38 = vpop.f32.mrf.mxu0  ;;  %v1271_v22 = vmax.f32 %v5287_v37, %v5286_v33  ;;  %v5299_v33 = vld [vmem:[#allocation30_spill] sm:$0xff] }
 0x1f6   : > { %v4814_v10 = vmax.f32 %v1255_v12, %v1620_v32  ;;  %v4816_v58 = vmax.f32 %v1268_v3, %v1565_v38  ;;  %v1584_v52 = vpop.f32.mrf.mxu1  ;;  %v5290_v12 = vld [vmem:[#allocation67_spill] sm:$0xff]  ;;  %v5292_v38 = vld [vmem:[#allocation68_spill] sm:$0xff] }
 0x1f7   : > { %v4818_v44 = vmax.f32 %v1269_v9, %v1584_v52  ;;  %v1225_v8 = vmax.f32 %v5291_v7, %v5290_v12  ;;  %v5293_v52 = vld [vmem:[#allocation27_spill] sm:$0xff] }
 0x1f8   : > { %v1226_v34 = vmax.f32 %v5293_v52, %v5292_v38  ;;  %v5305_v38 = vld [vmem:[#allocation32_spill] sm:$0xff] }
 0x1fc   : > { %v1603_v5 = vpop.f32.mrf.mxu2 }
 0x1fd   : > { %v4832_v3 = vmax.f32 %v1270_v27, %v1603_v5  ;;  %v1622_v45 = vpop.f32.mrf.mxu3  ;;  %v1634_v50 = vpop.f32.mrf.mxu0  ;;  %v5298_v27 = vld [vmem:[#allocation71_spill] sm:$0xff] }
 0x1fe   : > { %v4834_v51 = vmax.f32 %v1271_v22, %v1622_v45  ;;  %v4836_v46 = vmax.f32 %v1224_v14, %v1634_v50  ;;  %v1653_v9 = vpop.f32.mrf.mxu1  ;;  %v1241_v37 = vmax.f32 %v5299_v33, %v5298_v27  ;;  %v5303_v45 = vld [vmem:[#allocation31_spill] sm:$0xff] }
 0x1ff   : > { %v4838_v32 = vmax.f32 %v1225_v8, %v1653_v9  ;;  %v5302_v8 = vld [vmem:[#allocation72_spill] sm:$0xff]  ;;  %v5304_v9 = vld [vmem:[#allocation73_spill] sm:$0xff] }
 0x200   : > { %3389 = vmatmul.msk.bf16.vlgmr.msra.gmra.mxu0 %vm408_vm0, %v4512_v24  ;;  %3391 = vmatmul.msk.bf16.vlgmr.msra.gmra.mxu1 %vm408_vm0, %v4512_v24  ;;  %v1242_v50 = vmax.f32 %v5303_v45, %v5302_v8  ;;  %v1243_v52 = vmax.f32 %v5305_v38, %v5304_v9  ;;  %v5314_v8 = vld [vmem:[#allocation76_spill] sm:$0xff]  ;;  %v5315_v45 = vld [vmem:[#allocation35_spill] sm:$0xff]  ;;  %v5316_v9 = vld [vmem:[#allocation77_spill] sm:$0xff] }
 0x201   : > { %3393 = vmatmul.msk.bf16.vlgmr.msra.gmra.mxu2 %vm408_vm0, %v4512_v24  ;;  %v5317_v38 = vld [vmem:[#allocation36_spill] sm:$0xff] }
 0x202   : > { %3395 = vmatmul.msk.bf16.vlgmr.msra.gmra.mxu3 %vm408_vm0, %v4512_v24 }
 0x204   : > { %v1672_v15 = vpop.f32.mrf.mxu2 }
 0x205   : > { %v4856_v22 = vmax.f32 %v1226_v34, %v1672_v15  ;;  %v1691_v36 = vpop.f32.mrf.mxu3  ;;  %v1636_v28 = vpop.f32.mrf.mxu0  ;;  %v5309_v15 = vld [vmem:[#allocation34_spill] sm:$0xff] }
 0x206   : > { %v4858_v14 = vmax.f32 %v1227_v42, %v1691_v36  ;;  %v4860_v5 = vmax.f32 %v1240_v6, %v1636_v28  ;;  %v1655_v12 = vpop.f32.mrf.mxu1  ;;  %v1257_v27 = vmax.f32 %v5309_v15, %v5308_v62  ;;  %v5320_v62 = vld [vmem:[#allocation79_spill] sm:$0xff]  ;;  %v5321_v15 = vld [vmem:[#allocation38_spill] sm:$0xff] }
 0x207   : > { %v4862_v7 = vmax.f32 %v1241_v37, %v1655_v12 }
 0x208   : > { %5300 = vst [vmem:[#allocation57_spill] sm:$0xff] %v4860_v5  ;;  %v5330_v5 = vld [vmem:[#allocation41_spill] sm:$0xff] }
 0x209   : > { %5301 = vst [vmem:[#allocation16_spill] sm:$0xff] %v4862_v7  ;;  %v5329_v7 = vld [vmem:[#allocation82_spill] sm:$0xff] }
 0x20c   : > { %v1674_v34 = vpop.f32.mrf.mxu2 }
 0x20d   : > { %v4872_v42 = vmax.f32 %v1242_v50, %v1674_v34  ;;  %v1693_v6 = vpop.f32.mrf.mxu3  ;;  %v1639_v33 = vpop.f32.mrf.mxu0  ;;  %v1258_v50 = vmax.f32 %v5315_v45, %v5314_v8  ;;  %v5325_v45 = vld [vmem:[#allocation80_spill] sm:$0xff] }
 0x20e   : > { %v4874_v36 = vmax.f32 %v1243_v52, %v1693_v6  ;;  %v4876_v37 = vmax.f32 %v1256_v56, %v1639_v33  ;;  %v1658_v28 = vpop.f32.mrf.mxu1  ;;  %v1259_v52 = vmax.f32 %v5317_v38, %v5316_v9  ;;  %v1272_v56 = vmax.f32 %v5319_v54, %v5318_v17  ;;  %v5326_v9 = vld [vmem:[#allocation39_spill] sm:$0xff]  ;;  %v5328_v17 = vld [vmem:[#allocation40_spill] sm:$0xff] }
 0x20f   : > { %5310 = vst [vmem:[#allocation58_spill] sm:$0xff] %v4872_v42  ;;  %v4878_v12 = vmax.f32 %v1257_v27, %v1658_v28  ;;  %v1273_v27 = vmax.f32 %v5321_v15, %v5320_v62  ;;  %v1274_v38 = vmax.f32 %v5326_v9, %v5325_v45  ;;  %v5327_v42 = vld [vmem:[#allocation81_spill] sm:$0xff]  ;;  %v1228_v62 = vmax.f32 %v5330_v5, %v5329_v7  ;;  %v5332_v15 = vld [vmem:[#allocation42_spill] sm:$0xff]  ;;  %v5337_v5 = vld [vmem:[#allocation84_spill] sm:$0xff] }
 0x210   : > { %5311 = vst [vmem:[#allocation17_spill] sm:$0xff] %v4874_v36  ;;  %3390 = vmatmul.msk.bf16.gmra.mxu0 %vm408_vm0, %v4610_v35  ;;  %3392 = vmatmul.msk.bf16.gmra.mxu1 %vm408_vm0, %v4610_v35  ;;  %v1275_v54 = vmax.f32 %v5328_v17, %v5327_v42  ;;  %v5338_v7 = vld [vmem:[#allocation43_spill] sm:$0xff]  ;;  %v5339_v9 = vld [vmem:[#allocation85_spill] sm:$0xff] }
 0x211   : > { %5312 = vst [vmem:[#allocation59_spill] sm:$0xff] %v4876_v37  ;;  %3394 = vmatmul.msk.bf16.gmra.mxu2 %vm408_vm0, %v4610_v35  ;;  %v1230_v42 = vmax.f32 %v5338_v7, %v5337_v5  ;;  %v5346_v7 = vld [vmem:[#allocation88_spill] sm:$0xff] }
 0x212   : > { %5313 = vst [vmem:[#allocation18_spill] sm:$0xff] %v4878_v12  ;;  %3396 = vmatmul.msk.bf16.gmra.mxu3 %vm408_vm0, %v4610_v35 }
 0x214   : > { %v1677_v34 = vpop.f32.mrf.mxu2 }
 0x215   : > { %v4896_v6 = vmax.f32 %v1258_v50, %v1677_v34  ;;  %v1696_v33 = vpop.f32.mrf.mxu3  ;;  %v1641_v28 = vpop.f32.mrf.mxu0  ;;  %v5331_v34 = vld [vmem:[#allocation83_spill] sm:$0xff] }
 0x216   : > { %v4898_v12 = vmax.f32 %v1259_v52, %v1696_v33  ;;  %v4900_v37 = vmax.f32 %v1272_v56, %v1641_v28  ;;  %v1660_v36 = vpop.f32.mrf.mxu1 }
 0x217   : > { %5322 = vst [vmem:[#allocation60_spill] sm:$0xff] %v4896_v6  ;;  %v4902_v8 = vmax.f32 %v1273_v27, %v1660_v36  ;;  %v1229_v6 = vmax.f32 %v5332_v15, %v5331_v34  ;;  %v5343_v34 = vld [vmem:[#allocation87_spill] sm:$0xff]  ;;  %v5344_v15 = vld [vmem:[#allocation46_spill] sm:$0xff] }
 0x218   : > { %5323 = vst [vmem:[#allocation19_spill] sm:$0xff] %v4900_v37  ;;  %v5351_v37 = vld [vmem:[#allocation49_spill] sm:$0xff] }
 0x219   : > { %5324 = vst [vmem:[#allocation61_spill] sm:$0xff] %v4902_v8  ;;  %v5350_v8 = vld [vmem:[#allocation90_spill] sm:$0xff] }
 0x21c   : > { %v1679_v50 = vpop.f32.mrf.mxu2 }
 0x21d   : > { %v4912_v52 = vmax.f32 %v1274_v38, %v1679_v50  ;;  %v1698_v56 = vpop.f32.mrf.mxu3  ;;  %v1710_v33 = vpop.f32.mrf.mxu0  ;;  %v5340_v38 = vld [vmem:[#allocation44_spill] sm:$0xff] }
 0x21e   : > { %v4914_v28 = vmax.f32 %v1275_v54, %v1698_v56  ;;  %v4916_v36 = vmax.f32 %v1228_v62, %v1710_v33  ;;  %v1729_v27 = vpop.f32.mrf.mxu1  ;;  %v1231_v17 = vmax.f32 %v5340_v38, %v5339_v9  ;;  %v5342_v54 = vld [vmem:[#allocation45_spill] sm:$0xff]  ;;  %v1245_v56 = vmax.f32 %v5344_v15, %v5343_v34  ;;  %v5347_v9 = vld [vmem:[#allocation47_spill] sm:$0xff]  ;;  %v5353_v15 = vld [vmem:[#allocation50_spill] sm:$0xff] }
 0x21f   : > { %5333 = vst [vmem:[#allocation20_spill] sm:$0xff] %v4912_v52  ;;  %v4918_v45 = vmax.f32 %v1229_v6, %v1729_v27  ;;  %v5341_v6 = vld [vmem:[#allocation86_spill] sm:$0xff]  ;;  %v1246_v38 = vmax.f32 %v5347_v9, %v5346_v7  ;;  %v5348_v52 = vld [vmem:[#allocation89_spill] sm:$0xff]  ;;  %v1260_v34 = vmax.f32 %v5351_v37, %v5350_v8  ;;  %v5354_v37 = vld [vmem:[#allocation51_spill] sm:$0xff] }
 0x220   : > { %5334 = vst [vmem:[#allocation62_spill] sm:$0xff] %v4914_v28  ;;  %3397 = vmatmul.msk.bf16.vlgmr.msrb.gmra.mxu0 %vm408_vm0, %v4512_v24  ;;  %3399 = vmatmul.msk.bf16.vlgmr.msrb.gmra.mxu1 %vm408_vm0, %v4512_v24  ;;  %v1244_v62 = vmax.f32 %v5342_v54, %v5341_v6  ;;  %v5349_v6 = vld [vmem:[#allocation48_spill] sm:$0xff]  ;;  %v1262_v8 = vmax.f32 %v5354_v37, %v4624_v13  ;;  %v5356_v9 = vld [vmem:[#allocation53_spill] sm:$0xff] }
 0x221   : > { %5335 = vst [vmem:[#allocation21_spill] sm:$0xff] %v4916_v36  ;;  %3401 = vmatmul.msk.bf16.vlgmr.msrb.gmra.mxu2 %vm408_vm0, %v4512_v24  ;;  %v1247_v54 = vmax.f32 %v5349_v6, %v5348_v52  ;;  %v5355_v52 = vld [vmem:[#allocation52_spill] sm:$0xff] }
 0x222   : > { %5336 = vst [vmem:[#allocation63_spill] sm:$0xff] %v4918_v45  ;;  %3403 = vmatmul.msk.bf16.vlgmr.msrb.gmra.mxu3 %vm408_vm0, %v4512_v24 }
 0x224   : > { %v1748_v50 = vpop.f32.mrf.mxu2 }
 0x225   : > { %v4936_v33 = vmax.f32 %v1230_v42, %v1748_v50  ;;  %v1767_v27 = vpop.f32.mrf.mxu3  ;;  %v1712_v45 = vpop.f32.mrf.mxu0  ;;  %v5352_v50 = vld [vmem:[#allocation91_spill] sm:$0xff] }
 0x226   : > { %v4938_v36 = vmax.f32 %v1231_v17, %v1767_v27  ;;  %v4940_v24 = vmax.f32 %v1244_v62, %v1712_v45  ;;  %v1731_v28 = vpop.f32.mrf.mxu1 }
 0x227   : > { %5345 = vst [vmem:[#allocation22_spill] sm:$0xff] %v4936_v33  ;;  %v4942_v5 = vmax.f32 %v1245_v56, %v1731_v28  ;;  %v1261_v33 = vmax.f32 %v5353_v15, %v5352_v50 }
 0x22c   : > { %v1750_v42 = vpop.f32.mrf.mxu2 }
 0x22d   : > { %v4952_v17 = vmax.f32 %v1246_v38, %v1750_v42  ;;  %v1769_v45 = vpop.f32.mrf.mxu3  ;;  %v1715_v62 = vpop.f32.mrf.mxu0  ;;  %v1276_v38 = vmax.f32 %v5356_v9, %v4628_v61  ;;  %v5359_v61 = vld [vmem:[#allocation56_spill] sm:$0xff] }
 0x22e   : > { %v4954_v27 = vmax.f32 %v1247_v54, %v1769_v45  ;;  %v4956_v28 = vmax.f32 %v1260_v34, %v1715_v62  ;;  %v1734_v56 = vpop.f32.mrf.mxu1  ;;  %v5357_v54 = vld [vmem:[#allocation54_spill] sm:$0xff]  ;;  %v1279_v37 = vmax.f32 %v5359_v61, %v4642_v18 }
 0x22f   : > { %v4958_v7 = vmax.f32 %v1261_v33, %v1734_v56  ;;  %v1263_v33 = vmax.f32 %v5355_v52, %v4626_v19  ;;  %v1277_v34 = vmax.f32 %v5357_v54, %v4630_v29  ;;  %v5358_v19 = vld [vmem:[#allocation55_spill] sm:$0xff] }
 0x230   : > { %3398 = vmatmul.msk.bf16.gmra.mxu0 %vm408_vm0, %v4610_v35  ;;  %3400 = vmatmul.msk.bf16.gmra.mxu1 %vm408_vm0, %v4610_v35  ;;  %v1278_v56 = vmax.f32 %v5358_v19, %v4638_v47 }
 0x231   : > { %3402 = vmatmul.msk.bf16.gmra.mxu2 %vm408_vm0, %v4610_v35 }
 0x232   : > { %3404 = vmatmul.msk.bf16.gmra.mxu3 %vm408_vm0, %v4610_v35 }
 0x234   : > { %v1753_v6 = vpop.f32.mrf.mxu2 }
 0x235   : > { %v4976_v42 = vmax.f32 %v1262_v8, %v1753_v6  ;;  %v1772_v50 = vpop.f32.mrf.mxu3  ;;  %v1717_v15 = vpop.f32.mrf.mxu0 }
 0x236   : > { %v4978_v45 = vmax.f32 %v1263_v33, %v1772_v50  ;;  %v4980_v35 = vmax.f32 %v1276_v38, %v1717_v15  ;;  %v1736_v62 = vpop.f32.mrf.mxu1  ;;  %v5360_v33 = vld [vmem:[#allocation92_spill] sm:$0xff]  ;;  %v5361_v50 = vld [vmem:[#allocation93_spill] sm:$0xff] }
 0x237   : > { %v4982_v13 = vmax.f32 %v1277_v34, %v1736_v62 }
 0x23c   : > { %v1755_v52 = vpop.f32.mrf.mxu2 }
 0x23d   : > { %v4989_v29 = vmax.f32 %v1278_v56, %v1755_v52  ;;  %v1774_v8 = vpop.f32.mrf.mxu3  ;;  %v2043_v9 = vpop.f32.mrf.mxu0 }
 0x23e   : > { %v4991_v6 = vmax.f32 %v1279_v37, %v1774_v8  ;;  %v2338_v38 = vmax.f32 %v5360_v33, %v2043_v9  ;;  %v2062_v54 = vpop.f32.mrf.mxu1 }
 0x23f   : > { %v2339_v34 = vmax.f32 %v5361_v50, %v2062_v54 }
 0x240   : > { %v2402_v15 = vmax.f32 %v2338_v38, 0.0 }
 0x241   : > { %v2403_v62 = vmax.f32 %v2339_v34, 0.0 }
 0x242   : > { %2466 = vst [vmem:[%s4995_s9] sm:$0xff] %v2402_v15 }
 0x243   : > { %2467 = vst [vmem:[%s4995_s9 + $0x8] sm:$0xff] %v2403_v62 }
 0x244   : > { %v2081_v47 = vpop.f32.mrf.mxu2 }
 0x245   : > { %v2340_v18 = vmax.f32 %v4668_v26, %v2081_v47  ;;  %v2100_v19 = vpop.f32.mrf.mxu3  ;;  %v2045_v56 = vpop.f32.mrf.mxu0 }
 0x246   : > { %v2341_v61 = vmax.f32 %v4670_v20, %v2100_v19  ;;  %v2354_v37 = vmax.f32 %v4672_v21, %v2045_v56  ;;  %v2064_v52 = vpop.f32.mrf.mxu1 }
 0x247   : > { %v2404_v8 = vmax.f32 %v2340_v18, 0.0  ;;  %v2355_v9 = vmax.f32 %v4674_v11, %v2064_v52 }
 0x248   : > { %v2405_v33 = vmax.f32 %v2341_v61, 0.0  ;;  %v2418_v38 = vmax.f32 %v2354_v37, 0.0 }
 0x249   : > { %2468 = vst [vmem:[%s4995_s9 + $0x10] sm:$0xff] %v2404_v8  ;;  %v2419_v54 = vmax.f32 %v2355_v9, 0.0 }
 0x24a   : > { %2469 = vst [vmem:[%s4995_s9 + $0x18] sm:$0xff] %v2405_v33 }
 0x24b   : > { %2482 = vst [vmem:[%s4995_s9 + $0x80] sm:$0xff] %v2418_v38 }
 0x24c   : > { %2483 = vst [vmem:[%s4995_s9 + $0x88] sm:$0xff] %v2419_v54  ;;  %v2083_v26 = vpop.f32.mrf.mxu2 }
 0x24d   : > { %v2356_v20 = vmax.f32 %v4688_v23, %v2083_v26  ;;  %v2102_v50 = vpop.f32.mrf.mxu3  ;;  %v2048_v21 = vpop.f32.mrf.mxu0 }
 0x24e   : > { %v2357_v34 = vmax.f32 %v4690_v39, %v2102_v50  ;;  %v2370_v11 = vmax.f32 %v4692_v0, %v2048_v21  ;;  %v2067_v15 = vpop.f32.mrf.mxu1 }
 0x24f   : > { %v2420_v62 = vmax.f32 %v2356_v20, 0.0  ;;  %v2371_v47 = vmax.f32 %v4694_v40, %v2067_v15 }
 0x250   : > { %v2421_v18 = vmax.f32 %v2357_v34, 0.0  ;;  %v2434_v19 = vmax.f32 %v2370_v11, 0.0 }
 0x251   : > { %2484 = vst [vmem:[%s4995_s9 + $0x90] sm:$0xff] %v2420_v62  ;;  %v2435_v56 = vmax.f32 %v2371_v47, 0.0 }
 0x252   : > { %2485 = vst [vmem:[%s4995_s9 + $0x98] sm:$0xff] %v2421_v18 }
 0x253   : > { %2498 = vst [vmem:[%s4995_s9 + $0x100] sm:$0xff] %v2434_v19 }
 0x254   : > { %2499 = vst [vmem:[%s4995_s9 + $0x108] sm:$0xff] %v2435_v56  ;;  %v2086_v23 = vpop.f32.mrf.mxu2 }
 0x255   : > { %v2372_v39 = vmax.f32 %v4716_v57, %v2086_v23  ;;  %v2105_v61 = vpop.f32.mrf.mxu3  ;;  %v2050_v0 = vpop.f32.mrf.mxu0 }
 0x256   : > { %v2373_v37 = vmax.f32 %v4718_v43, %v2105_v61  ;;  %v2386_v40 = vmax.f32 %v4720_v53, %v2050_v0  ;;  %v2069_v52 = vpop.f32.mrf.mxu1 }
 0x257   : > { %v2436_v8 = vmax.f32 %v2372_v39, 0.0  ;;  %v2387_v9 = vmax.f32 %v4722_v55, %v2069_v52 }
 0x258   : > { %v2437_v33 = vmax.f32 %v2373_v37, 0.0  ;;  %v2450_v38 = vmax.f32 %v2386_v40, 0.0 }
 0x259   : > { %2500 = vst [vmem:[%s4995_s9 + $0x110] sm:$0xff] %v2436_v8  ;;  %v2451_v54 = vmax.f32 %v2387_v9, 0.0 }
 0x25a   : > { %2501 = vst [vmem:[%s4995_s9 + $0x118] sm:$0xff] %v2437_v33 }
 0x25b   : > { %2514 = vst [vmem:[%s4995_s9 + $0x180] sm:$0xff] %v2450_v38 }
 0x25c   : > { %2515 = vst [vmem:[%s4995_s9 + $0x188] sm:$0xff] %v2451_v54  ;;  %v2088_v57 = vpop.f32.mrf.mxu2 }
 0x25d   : > { %v2388_v43 = vmax.f32 %v4736_v49, %v2088_v57  ;;  %v2107_v26 = vpop.f32.mrf.mxu3  ;;  %v2119_v53 = vpop.f32.mrf.mxu0 }
 0x25e   : > { %v2389_v20 = vmax.f32 %v4738_v59, %v2107_v26  ;;  %v2342_v55 = vmax.f32 %v4740_v2, %v2119_v53  ;;  %v2138_v50 = vpop.f32.mrf.mxu1 }
 0x25f   : > { %v2452_v21 = vmax.f32 %v2388_v43, 0.0  ;;  %v2343_v34 = vmax.f32 %v4742_v60, %v2138_v50 }
 0x260   : > { %v2453_v11 = vmax.f32 %v2389_v20, 0.0  ;;  %v2406_v15 = vmax.f32 %v2342_v55, 0.0 }
 0x261   : > { %2516 = vst [vmem:[%s4995_s9 + $0x190] sm:$0xff] %v2452_v21  ;;  %v2407_v62 = vmax.f32 %v2343_v34, 0.0 }
 0x262   : > { %2517 = vst [vmem:[%s4995_s9 + $0x198] sm:$0xff] %v2453_v11 }
 0x263   : > { %2470 = vst [vmem:[%s4995_s9 + $0x20] sm:$0xff] %v2406_v15 }
 0x264   : > { %2471 = vst [vmem:[%s4995_s9 + $0x28] sm:$0xff] %v2407_v62  ;;  %v2157_v49 = vpop.f32.mrf.mxu2 }
 0x265   : > { %v2344_v59 = vmax.f32 %v4764_v30, %v2157_v49  ;;  %v2176_v47 = vpop.f32.mrf.mxu3  ;;  %v2121_v2 = vpop.f32.mrf.mxu0 }
 0x266   : > { %v2345_v18 = vmax.f32 %v4766_v31, %v2176_v47  ;;  %v2358_v60 = vmax.f32 %v4768_v48, %v2121_v2  ;;  %v2140_v19 = vpop.f32.mrf.mxu1 }
 0x267   : > { %v2408_v56 = vmax.f32 %v2344_v59, 0.0  ;;  %v2359_v23 = vmax.f32 %v4770_v4, %v2140_v19  ;;  %v5362_v19 = vld [vmem:[#allocation57_spill] sm:$0xff] }
 0x268   : > { %v2409_v39 = vmax.f32 %v2345_v18, 0.0  ;;  %v2422_v61 = vmax.f32 %v2358_v60, 0.0 }
 0x269   : > { %2472 = vst [vmem:[%s4995_s9 + $0x30] sm:$0xff] %v2408_v56  ;;  %v2423_v0 = vmax.f32 %v2359_v23, 0.0 }
 0x26a   : > { %2473 = vst [vmem:[%s4995_s9 + $0x38] sm:$0xff] %v2409_v39  ;;  %v5363_v39 = vld [vmem:[#allocation16_spill] sm:$0xff] }
 0x26b   : > { %2486 = vst [vmem:[%s4995_s9 + $0xa0] sm:$0xff] %v2422_v61 }
 0x26c   : > { %2487 = vst [vmem:[%s4995_s9 + $0xa8] sm:$0xff] %v2423_v0  ;;  %v2159_v30 = vpop.f32.mrf.mxu2 }
 0x26d   : > { %v2360_v31 = vmax.f32 %v4784_v41, %v2159_v30  ;;  %v2178_v37 = vpop.f32.mrf.mxu3  ;;  %v2124_v48 = vpop.f32.mrf.mxu0 }
 0x26e   : > { %v2361_v40 = vmax.f32 %v4786_v16, %v2178_v37  ;;  %v2374_v4 = vmax.f32 %v4788_v25, %v2124_v48  ;;  %v2143_v52 = vpop.f32.mrf.mxu1  ;;  %v5364_v37 = vld [vmem:[#allocation58_spill] sm:$0xff] }
 0x26f   : > { %v2424_v8 = vmax.f32 %v2360_v31, 0.0  ;;  %v2375_v9 = vmax.f32 %v4790_v63, %v2143_v52 }
 0x270   : > { %v2425_v33 = vmax.f32 %v2361_v40, 0.0  ;;  %v2438_v38 = vmax.f32 %v2374_v4, 0.0  ;;  %v5365_v4 = vld [vmem:[#allocation17_spill] sm:$0xff] }
 0x271   : > { %2488 = vst [vmem:[%s4995_s9 + $0xb0] sm:$0xff] %v2424_v8  ;;  %v2439_v54 = vmax.f32 %v2375_v9, 0.0  ;;  %v5366_v8 = vld [vmem:[#allocation59_spill] sm:$0xff] }
 0x272   : > { %2489 = vst [vmem:[%s4995_s9 + $0xb8] sm:$0xff] %v2425_v33 }
 0x273   : > { %2502 = vst [vmem:[%s4995_s9 + $0x120] sm:$0xff] %v2438_v38 }
 0x274   : > { %2503 = vst [vmem:[%s4995_s9 + $0x128] sm:$0xff] %v2439_v54  ;;  %v2162_v41 = vpop.f32.mrf.mxu2  ;;  %v5367_v54 = vld [vmem:[#allocation18_spill] sm:$0xff] }
 0x275   : > { %v2376_v16 = vmax.f32 %v4812_v1, %v2162_v41  ;;  %v2181_v57 = vpop.f32.mrf.mxu3  ;;  %v2126_v25 = vpop.f32.mrf.mxu0 }
 0x276   : > { %v2377_v43 = vmax.f32 %v4814_v10, %v2181_v57  ;;  %v2390_v63 = vmax.f32 %v4816_v58, %v2126_v25  ;;  %v2145_v26 = vpop.f32.mrf.mxu1 }
 0x277   : > { %v2440_v53 = vmax.f32 %v2376_v16, 0.0  ;;  %v2391_v20 = vmax.f32 %v4818_v44, %v2145_v26 }
 0x278   : > { %v2441_v55 = vmax.f32 %v2377_v43, 0.0  ;;  %v2454_v50 = vmax.f32 %v2390_v63, 0.0  ;;  %v5368_v63 = vld [vmem:[#allocation60_spill] sm:$0xff] }
 0x279   : > { %2504 = vst [vmem:[%s4995_s9 + $0x130] sm:$0xff] %v2440_v53  ;;  %v2455_v21 = vmax.f32 %v2391_v20, 0.0 }
 0x27a   : > { %2505 = vst [vmem:[%s4995_s9 + $0x138] sm:$0xff] %v2441_v55 }
 0x27b   : > { %2518 = vst [vmem:[%s4995_s9 + $0x1a0] sm:$0xff] %v2454_v50  ;;  %v5369_v50 = vld [vmem:[#allocation19_spill] sm:$0xff] }
 0x27c   : > { %2519 = vst [vmem:[%s4995_s9 + $0x1a8] sm:$0xff] %v2455_v21  ;;  %v2164_v1 = vpop.f32.mrf.mxu2 }
 0x27d   : > { %v2392_v10 = vmax.f32 %v4832_v3, %v2164_v1  ;;  %v2183_v34 = vpop.f32.mrf.mxu3  ;;  %v2195_v58 = vpop.f32.mrf.mxu0 }
 0x27e   : > { %v2393_v11 = vmax.f32 %v4834_v51, %v2183_v34  ;;  %v2346_v44 = vmax.f32 %v4836_v46, %v2195_v58  ;;  %v2214_v15 = vpop.f32.mrf.mxu1  ;;  %v5370_v34 = vld [vmem:[#allocation61_spill] sm:$0xff] }
 0x27f   : > { %v2456_v62 = vmax.f32 %v2392_v10, 0.0  ;;  %v2347_v49 = vmax.f32 %v4838_v32, %v2214_v15 }
 0x280   : > { %v2457_v59 = vmax.f32 %v2393_v11, 0.0  ;;  %v2410_v47 = vmax.f32 %v2346_v44, 0.0 }
 0x281   : > { %2520 = vst [vmem:[%s4995_s9 + $0x1b0] sm:$0xff] %v2456_v62  ;;  %v2411_v2 = vmax.f32 %v2347_v49, 0.0  ;;  %v5371_v49 = vld [vmem:[#allocation20_spill] sm:$0xff] }
 0x282   : > { %2521 = vst [vmem:[%s4995_s9 + $0x1b8] sm:$0xff] %v2457_v59 }
 0x283   : > { %2474 = vst [vmem:[%s4995_s9 + $0x40] sm:$0xff] %v2410_v47 }
 0x284   : > { %2475 = vst [vmem:[%s4995_s9 + $0x48] sm:$0xff] %v2411_v2  ;;  %v2233_v3 = vpop.f32.mrf.mxu2  ;;  %v5372_v2 = vld [vmem:[#allocation62_spill] sm:$0xff] }
 0x285   : > { %v2348_v51 = vmax.f32 %v4856_v22, %v2233_v3  ;;  %v2252_v18 = vpop.f32.mrf.mxu3  ;;  %v2197_v46 = vpop.f32.mrf.mxu0 }
 0x286   : > { %v2349_v60 = vmax.f32 %v4858_v14, %v2252_v18  ;;  %v2362_v32 = vmax.f32 %v5362_v19, %v2197_v46  ;;  %v2216_v56 = vpop.f32.mrf.mxu1  ;;  %v5374_v19 = vld [vmem:[#allocation63_spill] sm:$0xff] }
 0x287   : > { %v2412_v23 = vmax.f32 %v2348_v51, 0.0  ;;  %v2363_v61 = vmax.f32 %v5363_v39, %v2216_v56  ;;  %v5373_v51 = vld [vmem:[#allocation21_spill] sm:$0xff] }
 0x288   : > { %v2413_v0 = vmax.f32 %v2349_v60, 0.0  ;;  %v2426_v30 = vmax.f32 %v2362_v32, 0.0 }
 0x289   : > { %2476 = vst [vmem:[%s4995_s9 + $0x50] sm:$0xff] %v2412_v23  ;;  %v2427_v31 = vmax.f32 %v2363_v61, 0.0 }
 0x28a   : > { %2477 = vst [vmem:[%s4995_s9 + $0x58] sm:$0xff] %v2413_v0  ;;  %v5375_v0 = vld [vmem:[#allocation22_spill] sm:$0xff] }
 0x28b   : > { %2490 = vst [vmem:[%s4995_s9 + $0xc0] sm:$0xff] %v2426_v30 }
 0x28c   : > { %2491 = vst [vmem:[%s4995_s9 + $0xc8] sm:$0xff] %v2427_v31  ;;  %v2235_v22 = vpop.f32.mrf.mxu2 }
 0x28d   : > { %v2364_v14 = vmax.f32 %v5364_v37, %v2235_v22  ;;  %v2254_v48 = vpop.f32.mrf.mxu3  ;;  %v2200_v40 = vpop.f32.mrf.mxu0 }
 0x28e   : > { %v2365_v52 = vmax.f32 %v5365_v4, %v2254_v48  ;;  %v2378_v9 = vmax.f32 %v5366_v8, %v2200_v40  ;;  %v2219_v33 = vpop.f32.mrf.mxu1 }
 0x28f   : > { %v2428_v38 = vmax.f32 %v2364_v14, 0.0  ;;  %v2379_v41 = vmax.f32 %v5367_v54, %v2219_v33 }
 0x290   : > { %v2429_v16 = vmax.f32 %v2365_v52, 0.0  ;;  %v2442_v57 = vmax.f32 %v2378_v9, 0.0 }
 0x291   : > { %2492 = vst [vmem:[%s4995_s9 + $0xd0] sm:$0xff] %v2428_v38  ;;  %v2443_v25 = vmax.f32 %v2379_v41, 0.0 }
 0x292   : > { %2493 = vst [vmem:[%s4995_s9 + $0xd8] sm:$0xff] %v2429_v16 }
 0x293   : > { %2506 = vst [vmem:[%s4995_s9 + $0x140] sm:$0xff] %v2442_v57 }
 0x294   : > { %2507 = vst [vmem:[%s4995_s9 + $0x148] sm:$0xff] %v2443_v25  ;;  %v2238_v43 = vpop.f32.mrf.mxu2 }
 0x295   : > { %v2380_v26 = vmax.f32 %v5368_v63, %v2238_v43  ;;  %v2257_v53 = vpop.f32.mrf.mxu3  ;;  %v2202_v20 = vpop.f32.mrf.mxu0 }
 0x296   : > { %v2381_v55 = vmax.f32 %v4898_v12, %v2257_v53  ;;  %v2394_v21 = vmax.f32 %v5369_v50, %v2202_v20  ;;  %v2221_v1 = vpop.f32.mrf.mxu1 }
 0x297   : > { %v2444_v10 = vmax.f32 %v2380_v26, 0.0  ;;  %v2395_v58 = vmax.f32 %v5370_v34, %v2221_v1 }
 0x298   : > { %v2445_v11 = vmax.f32 %v2381_v55, 0.0  ;;  %v2458_v44 = vmax.f32 %v2394_v21, 0.0 }
 0x299   : > { %2508 = vst [vmem:[%s4995_s9 + $0x150] sm:$0xff] %v2444_v10  ;;  %v2459_v15 = vmax.f32 %v2395_v58, 0.0 }
 0x29a   : > { %2509 = vst [vmem:[%s4995_s9 + $0x158] sm:$0xff] %v2445_v11 }
 0x29b   : > { %2522 = vst [vmem:[%s4995_s9 + $0x1c0] sm:$0xff] %v2458_v44 }
 0x29c   : > { %2523 = vst [vmem:[%s4995_s9 + $0x1c8] sm:$0xff] %v2459_v15  ;;  %v2240_v62 = vpop.f32.mrf.mxu2 }
 0x29d   : > { %v2396_v12 = vmax.f32 %v5371_v49, %v2240_v62  ;;  %v2259_v59 = vpop.f32.mrf.mxu3  ;;  %v2271_v47 = vpop.f32.mrf.mxu0 }
 0x29e   : > { %v2397_v3 = vmax.f32 %v5372_v2, %v2259_v59  ;;  %v2350_v18 = vmax.f32 %v5373_v51, %v2271_v47  ;;  %v2290_v46 = vpop.f32.mrf.mxu1 }
 0x29f   : > { %v2460_v60 = vmax.f32 %v2396_v12, 0.0  ;;  %v2351_v32 = vmax.f32 %v5374_v19, %v2290_v46 }
 0x2a0   : > { %v2461_v56 = vmax.f32 %v2397_v3, 0.0  ;;  %v2414_v23 = vmax.f32 %v2350_v18, 0.0 }
 0x2a1   : > { %2524 = vst [vmem:[%s4995_s9 + $0x1d0] sm:$0xff] %v2460_v60  ;;  %v2415_v39 = vmax.f32 %v2351_v32, 0.0 }
 0x2a2   : > { %2525 = vst [vmem:[%s4995_s9 + $0x1d8] sm:$0xff] %v2461_v56 }
 0x2a3   : > { %2478 = vst [vmem:[%s4995_s9 + $0x60] sm:$0xff] %v2414_v23 }
 0x2a4   : > { %2479 = vst [vmem:[%s4995_s9 + $0x68] sm:$0xff] %v2415_v39  ;;  %v2309_v61 = vpop.f32.mrf.mxu2 }
 0x2a5   : > { %v2352_v30 = vmax.f32 %v5375_v0, %v2309_v61  ;;  %v2328_v31 = vpop.f32.mrf.mxu3  ;;  %v2273_v22 = vpop.f32.mrf.mxu0 }
 0x2a6   : > { %v2353_v37 = vmax.f32 %v4938_v36, %v2328_v31  ;;  %v2366_v14 = vmax.f32 %v4940_v24, %v2273_v22  ;;  %v2292_v48 = vpop.f32.mrf.mxu1 }
 0x2a7   : > { %v2416_v40 = vmax.f32 %v2352_v30, 0.0  ;;  %v2367_v4 = vmax.f32 %v4942_v5, %v2292_v48 }
 0x2a8   : > { %v2417_v52 = vmax.f32 %v2353_v37, 0.0  ;;  %v2430_v8 = vmax.f32 %v2366_v14, 0.0 }
 0x2a9   : > { %2480 = vst [vmem:[%s4995_s9 + $0x70] sm:$0xff] %v2416_v40  ;;  %v2431_v9 = vmax.f32 %v2367_v4, 0.0 }
 0x2aa   : > { %2481 = vst [vmem:[%s4995_s9 + $0x78] sm:$0xff] %v2417_v52 }
 0x2ab   : > { %2494 = vst [vmem:[%s4995_s9 + $0xe0] sm:$0xff] %v2430_v8 }
 0x2ac   : > { %2495 = vst [vmem:[%s4995_s9 + $0xe8] sm:$0xff] %v2431_v9  ;;  %v2311_v33 = vpop.f32.mrf.mxu2 }
 0x2ad   : > { %v2368_v36 = vmax.f32 %v4952_v17, %v2311_v33  ;;  %v2330_v24 = vpop.f32.mrf.mxu3  ;;  %v2276_v38 = vpop.f32.mrf.mxu0 }
 0x2ae   : > { %v2369_v5 = vmax.f32 %v4954_v27, %v2330_v24  ;;  %v2382_v54 = vmax.f32 %v4956_v28, %v2276_v38  ;;  %v2295_v41 = vpop.f32.mrf.mxu1 }
 0x2af   : > { %v2432_v16 = vmax.f32 %v2368_v36, 0.0  ;;  %v2383_v57 = vmax.f32 %v4958_v7, %v2295_v41 }
 0x2b0   : > { %v2433_v25 = vmax.f32 %v2369_v5, 0.0  ;;  %v2446_v43 = vmax.f32 %v2382_v54, 0.0 }
 0x2b1   : > { %2496 = vst [vmem:[%s4995_s9 + $0xf0] sm:$0xff] %v2432_v16  ;;  %v2447_v63 = vmax.f32 %v2383_v57, 0.0 }
 0x2b2   : > { %2497 = vst [vmem:[%s4995_s9 + $0xf8] sm:$0xff] %v2433_v25 }
 0x2b3   : > { %2510 = vst [vmem:[%s4995_s9 + $0x160] sm:$0xff] %v2446_v43 }
 0x2b4   : > { %2511 = vst [vmem:[%s4995_s9 + $0x168] sm:$0xff] %v2447_v63  ;;  %v2314_v17 = vpop.f32.mrf.mxu2 }
 0x2b5   : > { %v2384_v27 = vmax.f32 %v4976_v42, %v2314_v17  ;;  %v2333_v28 = vpop.f32.mrf.mxu3  ;;  %v2278_v7 = vpop.f32.mrf.mxu0 }
 0x2b6   : > { %v2385_v26 = vmax.f32 %v4978_v45, %v2333_v28  ;;  %v2398_v53 = vmax.f32 %v4980_v35, %v2278_v7  ;;  %v2297_v20 = vpop.f32.mrf.mxu1 }
 0x2b7   : > { %v2448_v55 = vmax.f32 %v2384_v27, 0.0  ;;  %v2399_v50 = vmax.f32 %v4982_v13, %v2297_v20 }
 0x2b8   : > { %v2449_v21 = vmax.f32 %v2385_v26, 0.0  ;;  %v2462_v1 = vmax.f32 %v2398_v53, 0.0 }
 0x2b9   : > { %2512 = vst [vmem:[%s4995_s9 + $0x170] sm:$0xff] %v2448_v55  ;;  %v2463_v10 = vmax.f32 %v2399_v50, 0.0 }
 0x2ba   : > { %2513 = vst [vmem:[%s4995_s9 + $0x178] sm:$0xff] %v2449_v21 }
 0x2bb   : > { %2526 = vst [vmem:[%s4995_s9 + $0x1e0] sm:$0xff] %v2462_v1 }
 0x2bc   : > { %2527 = vst [vmem:[%s4995_s9 + $0x1e8] sm:$0xff] %v2463_v10  ;;  %v2316_v42 = vpop.f32.mrf.mxu2 }
 0x2bd   : > { %v2400_v45 = vmax.f32 %v4989_v29, %v2316_v42  ;;  %v2335_v35 = vpop.f32.mrf.mxu3 }
 0x2be   : > { %v2401_v13 = vmax.f32 %v4991_v6, %v2335_v35 }
 0x2bf   : > { %v2464_v34 = vmax.f32 %v2400_v45, 0.0 }
 0x2c0   : > { %v2465_v58 = vmax.f32 %v2401_v13, 0.0 }
 0x2c1   : > { %2528 = vst [vmem:[%s4995_s9 + $0x1f0] sm:$0xff] %v2464_v34 }
 0x2c2   : > { %2529 = vst [vmem:[%s4995_s9 + $0x1f8] sm:$0xff] %v2465_v58 }
 0x2c3   : > { %3726 = shalt.err (!%p3723_p13)
}
 0x2c4   : > { %s3808_s29 = smov 2048   ;;  %s3809_s5 = smov 4096  }
 0x2c5   : > { %s3810_s8 = smov 128  }
 0x2c6   : > { %3547 = dma.vmem_to_hbm [thread:$0]  (%p3916_p3), %s2546_s4, 8192, %s2548_s17, %s2531_s18, %s3808_s29, %s3809_s5, %s3810_s8  }
 0x2c7 PF: > { %s5376_s22 = sld [smem:[#allocation11_spill]]  ;;  %p3564_p0 = scmp.ge.s32.totalorder %s3801_s16, 2 }
 0x2c9   : > { %p3558_p5 = pnand %p3564_p0, %p3885_p6 }
 0x2cb   : > { %p3559_p7 = pneg %p3558_p5 }
 0x2cd   : > { %s2562_s9 = sand.u32 1, %s5376_s22  }
 0x2ce   : > { %s2563_s14 = scalar_lea.sflag [#allocation4], %s2562_s9 }
 0x2cf   : > { %3768 = dma.done.wait (%p3559_p7), %s2563_s14, 8192  }
 0x2d0   : > { %3770 = vsyncadd (%p3559_p7), %s2563_s14, 4294959104  ;;  %s19_s16 = sadd.s32 1, %s3801_s16   ;;  %s5378_s12 = sld [smem:[#allocation12_spill]] }
 0x2d1   : > { %p16_p9 = scmp.ge.s32.totalorder %s19_s16, 6   ;;  %s5379_s14 = sld [smem:[#allocation14_spill]] }
 0x2d2   : > { %s5380_s7 = sld [smem:[#allocation15_spill]]  ;;  %s5381_s9 = smov %s3777_s10 }
 0x2d3   : > { %s5382_s10 = smov %s3781_s11  ;;  %s5383_s11 = smov %s3933_s30 }
 0x2d4   : > { %s5384_s13 = smov %s3797_s15  ;;  %18 = sbr.rel (!%p16_p9) target bundleno = 10 (0xa), region = 80 }
 0x2d8   : > { %s5385_s15 = smov %s5380_s7 }
 0x2d9   :  { %2569 = vsyncpa [#allocation3], 1 }
 0x2da   :  { %2571 = vsyncpa [#allocation3 + $0x1], 1 }
 0x2db   :  { %2572 = vsyncpa [#allocation6], 1 }
 0x2dc   :  { %2573 = vsyncpa [#allocation4], 1 }
 0x2dd   :  { %2575 = vsyncpa [#allocation4 + $0x1], 1 }

</bundles_post_ra>
